<compile_context>
chip_gen: v6e
topology: v6e:2x2x1
jax: 0.10.0
libtpu: 0.0.40
codegen_flags: <defaults>
</compile_context>

<pallas_src>
import math
import functools

import jax
import jax.numpy as jnp
from jax import lax
from jax.experimental import pallas as pl
from jax.experimental.pallas import tpu as pltpu

# Full-f32 matmuls everywhere (kernel already computes exact f32 on the MXU;
# this makes the XLA reference match it instead of using bf16 passes).
jax.config.update("jax_default_matmul_precision", "highest")


def _layernorm(y, gamma, beta, eps=1e-5):
    mu = jnp.mean(y, axis=-1, keepdims=True)
    var = jnp.mean((y - mu) ** 2, axis=-1, keepdims=True)
    return (y - mu) * lax.rsqrt(var + eps) * gamma + beta


def _encoder_block_kernel(
    x_ref,
    wqkv_ref, bqkv_ref,
    wz_ref, bz_ref, g1_ref, be1_ref,
    wf1_ref, bf1_ref, wf2_ref, bf2_ref,
    g2_ref, be2_ref,
    out_ref,
    z_scr,
    *, batch, seq, head, q_k_size, v_size,
):
    x = x_ref[...]                                    # (B*S, E), rows = batch*seq

    # --- fused Q/K/V projection: one MXU matmul instead of three ----------
    qkv = jnp.dot(x, wqkv_ref[...], preferred_element_type=jnp.float32) + bqkv_ref[...]
    hqk = head * q_k_size

    scale = 1.0 / math.sqrt(q_k_size)

    # --- multi-head self-attention ----------------------------------------
    # TODO(synk): at realistic S / head counts, replace this static (head,
    # batch) loop with a (batch*head)-batched einsum + flash-style KV tiling
    # (online softmax) on an 'arbitrary' grid axis, keep a >=2-wide 'parallel'
    # grid axis for the two v7x TensorCores, and cast MXU operands to bf16
    # with f32 accumulation.
    for h in range(head):
        q_h = qkv[:, h * q_k_size:(h + 1) * q_k_size]                   # (B*S, qk)
        k_h = qkv[:, hqk + h * q_k_size: hqk + (h + 1) * q_k_size]      # (B*S, qk)
        v_h = qkv[:, 2 * hqk + h * v_size: 2 * hqk + (h + 1) * v_size]  # (B*S, v)
        for b in range(batch):
            r0 = b * seq
            qbh = q_h[r0:r0 + seq, :]
            kbh = k_h[r0:r0 + seq, :]
            vbh = v_h[r0:r0 + seq, :]
            # scores = q @ k.T without materializing a transpose.
            s = lax.dot_general(
                qbh, kbh,
                dimension_numbers=(((1,), (1,)), ((), ())),
                preferred_element_type=jnp.float32,
            ) * scale                                                   # (S, S)
            s = s - jnp.max(s, axis=-1, keepdims=True)
            e = jnp.exp(s)
            p = e / jnp.sum(e, axis=-1, keepdims=True)                  # exact softmax
            zbh = jnp.dot(p, vbh, preferred_element_type=jnp.float32)   # (S, v)
            # write this head's output into its lane range (no lane concat).
            z_scr[r0:r0 + seq, h * v_size:(h + 1) * v_size] = zbh

    # --- output projection + residual + LayerNorm --------------------------
    z = jnp.dot(z_scr[...], wz_ref[...], preferred_element_type=jnp.float32) + bz_ref[...]
    out1 = _layernorm(z + x, g1_ref[...], be1_ref[...])

    # --- feedforward + residual + LayerNorm ---------------------------------
    h1 = jnp.dot(out1, wf1_ref[...], preferred_element_type=jnp.float32) + bf1_ref[...]
    h1 = jnp.maximum(h1, 0.0)
    h2 = jnp.dot(h1, wf2_ref[...], preferred_element_type=jnp.float32) + bf2_ref[...]
    out2 = _layernorm(h2 + out1, g2_ref[...], be2_ref[...])

    out_ref[...] = out2.astype(out_ref.dtype)


def encoder_block(x, params, *, head, q_k_size, v_size):
    B, S, E = x.shape
    (wq, bq, wk, bk, wv, bv, wz, bz, g1, be1,
     wf1, bf1, wf2, bf2, g2, be2) = params

    # Fuse Q/K/V weights & biases into one projection (wrapper-side, free).
    wqkv = jnp.concatenate([wq, wk, wv], axis=1)        # (E, 2*H*qk + H*v)
    bqkv = jnp.concatenate([bq, bk, bv], axis=1)        # (1, 2*H*qk + H*v)

    # Fold (batch, seq) onto the row axis -> single grid step, fused row-wise
    # matmuls / LayerNorms over all B*S rows.
    x2 = x.reshape(B * S, E)

    weights = (wqkv, bqkv, wz, bz, g1, be1, wf1, bf1, wf2, bf2, g2, be2)

    in_specs = [pl.BlockSpec((B * S, E), lambda i: (0, 0))]
    for w in weights:
        in_specs.append(pl.BlockSpec(w.shape, lambda i, n=w.ndim: (0,) * n))

    f_size = wf1.shape[1]
    flops = 2 * (B * S) * E * wqkv.shape[1]                 # fused QKV projection
    flops += 2 * B * head * S * S * (q_k_size + v_size)     # scores + attn @ V
    flops += 2 * (B * S) * (head * v_size) * E              # output projection
    flops += 2 * (B * S) * E * f_size * 2                   # FFN (two matmuls)
    transcendentals = B * head * S * S + 4 * B * S          # exp + rsqrt
    bytes_accessed = 4 * (2 * x2.size + sum(int(w.size) for w in weights))

    kernel = functools.partial(
        _encoder_block_kernel,
        batch=B, seq=S, head=head, q_k_size=q_k_size, v_size=v_size,
    )

    out2d = pl.pallas_call(
        kernel,
        out_shape=jax.ShapeDtypeStruct((B * S, E), x.dtype),
        grid_spec=pltpu.PrefetchScalarGridSpec(
            num_scalar_prefetch=0,
            grid=(1,),
            in_specs=in_specs,
            out_specs=pl.BlockSpec((B * S, E), lambda i: (0, 0)),
            scratch_shapes=[pltpu.VMEM((B * S, head * v_size), jnp.float32)],
        ),
        compiler_params=pltpu.CompilerParams(
            dimension_semantics=("arbitrary",),
            vmem_limit_bytes=32 * 1024 * 1024,
        ),
        cost_estimate=pl.CostEstimate(
            flops=flops,
            transcendentals=transcendentals,
            bytes_accessed=bytes_accessed,
        ),
    )(x2, *weights)

    return out2d.reshape(B, S, E)


def _reference(x, params, *, head, q_k_size, v_size):
    (wq, bq, wk, bk, wv, bv, wz, bz, g1, be1, wf1, bf1, wf2, bf2, g2, be2) = params

    def ln(y, g, b):
        mu = jnp.mean(y, axis=-1, keepdims=True)
        var = jnp.mean((y - mu) ** 2, axis=-1, keepdims=True)
        return (y - mu) * lax.rsqrt(var + 1e-5) * g + b

    q = x @ wq + bq
    k = x @ wk + bk
    v = x @ wv + bv
    B, S, _ = x.shape
    qh = q.reshape(B, S, head, q_k_size).transpose(0, 2, 1, 3)
    kh = k.reshape(B, S, head, q_k_size).transpose(0, 2, 1, 3)
    vh = v.reshape(B, S, head, v_size).transpose(0, 2, 1, 3)
    s = jnp.einsum("bhqd,bhkd->bhqk", qh, kh,
                   precision=lax.Precision.HIGHEST) / math.sqrt(q_k_size)
    p = jax.nn.softmax(s, axis=-1)
    z = jnp.einsum("bhqk,bhkd->bhqd", p, vh,
                   precision=lax.Precision.HIGHEST)
    z = z.transpose(0, 2, 1, 3).reshape(B, S, head * v_size)
    z = z @ wz + bz
    o1 = ln(z + x, g1, be1)
    o2 = jnp.maximum(o1 @ wf1 + bf1, 0.0) @ wf2 + bf2
    return ln(o2 + o1, g2, be2)


if __name__ == "__main__":
    # Module hyperparameters (small, consistent with the PyTorch module).
    batch, seq = 2, 8
    embedding_size, q_k_size, v_size, f_size, head = 32, 16, 16, 64, 2

    key = jax.random.PRNGKey(0)
    keys = jax.random.split(key, 16)

    def glorot(k, shape):
        fan_in = shape[0]
        return (jax.random.normal(k, shape, jnp.float32) / math.sqrt(fan_in))

    # Weights in (in, out) layout (already "transposed" vs. PyTorch Linear).
    wq = glorot(keys[0], (embedding_size, head * q_k_size))
    bq = jax.random.normal(keys[1], (1, head * q_k_size), jnp.float32) * 0.01
    wk = glorot(keys[2], (embedding_size, head * q_k_size))
    bk = jax.random.normal(keys[3], (1, head * q_k_size), jnp.float32) * 0.01
    wv = glorot(keys[4], (embedding_size, head * v_size))
    bv = jax.random.normal(keys[5], (1, head * v_size), jnp.float32) * 0.01
    wz = glorot(keys[6], (head * v_size, embedding_size))
    bz = jax.random.normal(keys[7], (1, embedding_size), jnp.float32) * 0.01
    g1 = jnp.ones((1, embedding_size), jnp.float32)
    be1 = jnp.zeros((1, embedding_size), jnp.float32)
    wf1 = glorot(keys[8], (embedding_size, f_size))
    bf1 = jax.random.normal(keys[9], (1, f_size), jnp.float32) * 0.01
    wf2 = glorot(keys[10], (f_size, embedding_size))
    bf2 = jax.random.normal(keys[11], (1, embedding_size), jnp.float32) * 0.01
    g2 = jnp.ones((1, embedding_size), jnp.float32)
    be2 = jnp.zeros((1, embedding_size), jnp.float32)

    params = (wq, bq, wk, bk, wv, bv, wz, bz, g1, be1, wf1, bf1, wf2, bf2, g2, be2)

    x = jax.random.normal(keys[12], (batch, seq, embedding_size), jnp.float32)

    out = encoder_block(x, params, head=head, q_k_size=q_k_size, v_size=v_size)
    out = jax.block_until_ready(out)

    ref = _reference(x, params, head=head, q_k_size=q_k_size, v_size=v_size)
    assert out.shape == (batch, seq, embedding_size)
    assert jnp.allclose(out, ref, atol=2e-3, rtol=2e-3), (
        "mismatch vs reference, max abs err = %e"
        % float(jnp.max(jnp.abs(out - ref))))

    print("KERNEL_OK")
</pallas_src>

<mosaic_0001>
module attributes {stable_mosaic.version = 11 : i64} {
  func.func @_encoder_block_kernel(%arg0: i32, %arg1: memref<16x32xf32, #tpu.memory_space<vmem>>, %arg2: memref<32x96xf32, #tpu.memory_space<vmem>>, %arg3: memref<1x96xf32, #tpu.memory_space<vmem>>, %arg4: memref<32x32xf32, #tpu.memory_space<vmem>>, %arg5: memref<1x32xf32, #tpu.memory_space<vmem>>, %arg6: memref<1x32xf32, #tpu.memory_space<vmem>>, %arg7: memref<1x32xf32, #tpu.memory_space<vmem>>, %arg8: memref<32x64xf32, #tpu.memory_space<vmem>>, %arg9: memref<1x64xf32, #tpu.memory_space<vmem>>, %arg10: memref<64x32xf32, #tpu.memory_space<vmem>>, %arg11: memref<1x32xf32, #tpu.memory_space<vmem>>, %arg12: memref<1x32xf32, #tpu.memory_space<vmem>>, %arg13: memref<1x32xf32, #tpu.memory_space<vmem>>, %arg14: memref<16x32xf32, #tpu.memory_space<vmem>>, %arg15: memref<16x32xf32, #tpu.memory_space<vmem>>) attributes {dimension_semantics = [#tpu.dimension_semantics<arbitrary>], iteration_bounds = array<i64: 1>, scalar_prefetch = 0 : i64, scratch_operands = 1 : i64, tpu.core_type = #tpu.core_type<tc>, window_params = [{pipeline_mode = #tpu.pipeline_mode<synchronous>, transform_indices = @transform_0, window_bounds = array<i64: 16, 32>}, {pipeline_mode = #tpu.pipeline_mode<synchronous>, transform_indices = @transform_1, window_bounds = array<i64: 32, 96>}, {pipeline_mode = #tpu.pipeline_mode<synchronous>, transform_indices = @transform_2, window_bounds = array<i64: 1, 96>}, {pipeline_mode = #tpu.pipeline_mode<synchronous>, transform_indices = @transform_3, window_bounds = array<i64: 32, 32>}, {pipeline_mode = #tpu.pipeline_mode<synchronous>, transform_indices = @transform_4, window_bounds = array<i64: 1, 32>}, {pipeline_mode = #tpu.pipeline_mode<synchronous>, transform_indices = @transform_5, window_bounds = array<i64: 1, 32>}, {pipeline_mode = #tpu.pipeline_mode<synchronous>, transform_indices = @transform_6, window_bounds = array<i64: 1, 32>}, {pipeline_mode = #tpu.pipeline_mode<synchronous>, transform_indices = @transform_7, window_bounds = array<i64: 32, 64>}, {pipeline_mode = #tpu.pipeline_mode<synchronous>, transform_indices = @transform_8, window_bounds = array<i64: 1, 64>}, {pipeline_mode = #tpu.pipeline_mode<synchronous>, transform_indices = @transform_9, window_bounds = array<i64: 64, 32>}, {pipeline_mode = #tpu.pipeline_mode<synchronous>, transform_indices = @transform_10, window_bounds = array<i64: 1, 32>}, {pipeline_mode = #tpu.pipeline_mode<synchronous>, transform_indices = @transform_11, window_bounds = array<i64: 1, 32>}, {pipeline_mode = #tpu.pipeline_mode<synchronous>, transform_indices = @transform_12, window_bounds = array<i64: 1, 32>}, {pipeline_mode = #tpu.pipeline_mode<synchronous>, transform_indices = @transform_13, window_bounds = array<i64: 16, 32>}]} {
    %c0 = arith.constant 0 : index
    %c0_0 = arith.constant 0 : index
    %0 = vector.load %arg1[%c0, %c0_0] : memref<16x32xf32, #tpu.memory_space<vmem>>, vector<16x32xf32>
    %c0_1 = arith.constant 0 : index
    %c0_2 = arith.constant 0 : index
    %1 = vector.load %arg2[%c0_1, %c0_2] : memref<32x96xf32, #tpu.memory_space<vmem>>, vector<32x96xf32>
    %cst = arith.constant dense<0.000000e+00> : vector<16x96xf32>
    %2 = tpu.matmul %0, %1, %cst {dimension_numbers = #tpu.dot_dimension_numbers<[1], [0], [0], [1], [0, 0, 1, 1], [], []>, precision = #tpu.contract_precision<fp32>} : vector<16x32xf32>, vector<32x96xf32>, vector<16x96xf32> -> vector<16x96xf32>
    %c0_3 = arith.constant 0 : index
    %c0_4 = arith.constant 0 : index
    %3 = vector.load %arg3[%c0_3, %c0_4] : memref<1x96xf32, #tpu.memory_space<vmem>>, vector<1x96xf32>
    %4 = vector.broadcast %3 : vector<1x96xf32> to vector<16x96xf32>
    %5 = arith.addf %2, %4 : vector<16x96xf32>
    %6 = vector.extract_strided_slice %5 {offsets = [0, 0], sizes = [16, 16], strides = [1, 1]} : vector<16x96xf32> to vector<16x16xf32>
    %7 = vector.extract_strided_slice %5 {offsets = [0, 32], sizes = [16, 16], strides = [1, 1]} : vector<16x96xf32> to vector<16x16xf32>
    %8 = vector.extract_strided_slice %5 {offsets = [0, 64], sizes = [16, 16], strides = [1, 1]} : vector<16x96xf32> to vector<16x16xf32>
    %9 = vector.extract_strided_slice %6 {offsets = [0, 0], sizes = [8, 16], strides = [1, 1]} : vector<16x16xf32> to vector<8x16xf32>
    %10 = vector.extract_strided_slice %7 {offsets = [0, 0], sizes = [8, 16], strides = [1, 1]} : vector<16x16xf32> to vector<8x16xf32>
    %11 = vector.extract_strided_slice %8 {offsets = [0, 0], sizes = [8, 16], strides = [1, 1]} : vector<16x16xf32> to vector<8x16xf32>
    %cst_5 = arith.constant dense<0.000000e+00> : vector<8x8xf32>
    %12 = tpu.matmul %9, %10, %cst_5 {dimension_numbers = #tpu.dot_dimension_numbers<[1], [1], [0], [0], [0, 0, 1, 0], [], []>, precision = #tpu.contract_precision<fp32>} : vector<8x16xf32>, vector<8x16xf32>, vector<8x8xf32> -> vector<8x8xf32>
    %cst_6 = arith.constant 2.500000e-01 : f32
    %13 = vector.broadcast %cst_6 : f32 to vector<8x8xf32>
    %14 = arith.mulf %12, %13 : vector<8x8xf32>
    %cst_7 = arith.constant dense<0xFF800000> : vector<8xf32>
    %15 = vector.multi_reduction <maximumf>, %14, %cst_7 [1] : vector<8x8xf32> to vector<8xf32>
    %16 = vector.shape_cast %15 : vector<8xf32> to vector<8x1xf32>
    %17 = vector.broadcast %16 : vector<8x1xf32> to vector<8x8xf32>
    %18 = arith.subf %14, %17 : vector<8x8xf32>
    %19 = math.exp %18 : vector<8x8xf32>
    %cst_8 = arith.constant dense<0.000000e+00> : vector<8xf32>
    %20 = vector.multi_reduction <add>, %19, %cst_8 [1] : vector<8x8xf32> to vector<8xf32>
    %21 = vector.shape_cast %20 : vector<8xf32> to vector<8x1xf32>
    %22 = vector.broadcast %21 : vector<8x1xf32> to vector<8x8xf32>
    %23 = arith.divf %19, %22 : vector<8x8xf32>
    %cst_9 = arith.constant dense<0.000000e+00> : vector<8x16xf32>
    %24 = tpu.matmul %23, %11, %cst_9 {dimension_numbers = #tpu.dot_dimension_numbers<[1], [0], [0], [1], [0, 0, 1, 1], [], []>, precision = #tpu.contract_precision<fp32>} : vector<8x8xf32>, vector<8x16xf32>, vector<8x16xf32> -> vector<8x16xf32>
    %c0_10 = arith.constant 0 : index
    %c0_11 = arith.constant 0 : index
    %25 = vector.load %arg15[%c0_10, %c0_11] : memref<16x32xf32, #tpu.memory_space<vmem>>, vector<8x16xf32>
    tpu.vector_store %arg15[%c0_10, %c0_11], %24 {strides = array<i32>} : memref<16x32xf32, #tpu.memory_space<vmem>>, vector<8x16xf32>,
    %26 = vector.extract_strided_slice %6 {offsets = [8, 0], sizes = [8, 16], strides = [1, 1]} : vector<16x16xf32> to vector<8x16xf32>
    %27 = vector.extract_strided_slice %7 {offsets = [8, 0], sizes = [8, 16], strides = [1, 1]} : vector<16x16xf32> to vector<8x16xf32>
    %28 = vector.extract_strided_slice %8 {offsets = [8, 0], sizes = [8, 16], strides = [1, 1]} : vector<16x16xf32> to vector<8x16xf32>
    %cst_12 = arith.constant dense<0.000000e+00> : vector<8x8xf32>
    %29 = tpu.matmul %26, %27, %cst_12 {dimension_numbers = #tpu.dot_dimension_numbers<[1], [1], [0], [0], [0, 0, 1, 0], [], []>, precision = #tpu.contract_precision<fp32>} : vector<8x16xf32>, vector<8x16xf32>, vector<8x8xf32> -> vector<8x8xf32>
    %cst_13 = arith.constant 2.500000e-01 : f32
    %30 = vector.broadcast %cst_13 : f32 to vector<8x8xf32>
    %31 = arith.mulf %29, %30 : vector<8x8xf32>
    %cst_14 = arith.constant dense<0xFF800000> : vector<8xf32>
    %32 = vector.multi_reduction <maximumf>, %31, %cst_14 [1] : vector<8x8xf32> to vector<8xf32>
    %33 = vector.shape_cast %32 : vector<8xf32> to vector<8x1xf32>
    %34 = vector.broadcast %33 : vector<8x1xf32> to vector<8x8xf32>
    %35 = arith.subf %31, %34 : vector<8x8xf32>
    %36 = math.exp %35 : vector<8x8xf32>
    %cst_15 = arith.constant dense<0.000000e+00> : vector<8xf32>
    %37 = vector.multi_reduction <add>, %36, %cst_15 [1] : vector<8x8xf32> to vector<8xf32>
    %38 = vector.shape_cast %37 : vector<8xf32> to vector<8x1xf32>
    %39 = vector.broadcast %38 : vector<8x1xf32> to vector<8x8xf32>
    %40 = arith.divf %36, %39 : vector<8x8xf32>
    %cst_16 = arith.constant dense<0.000000e+00> : vector<8x16xf32>
    %41 = tpu.matmul %40, %28, %cst_16 {dimension_numbers = #tpu.dot_dimension_numbers<[1], [0], [0], [1], [0, 0, 1, 1], [], []>, precision = #tpu.contract_precision<fp32>} : vector<8x8xf32>, vector<8x16xf32>, vector<8x16xf32> -> vector<8x16xf32>
    %c8 = arith.constant 8 : index
    %c0_17 = arith.constant 0 : index
    %42 = vector.load %arg15[%c8, %c0_17] : memref<16x32xf32, #tpu.memory_space<vmem>>, vector<8x16xf32>
    tpu.vector_store %arg15[%c8, %c0_17], %41 {strides = array<i32>} : memref<16x32xf32, #tpu.memory_space<vmem>>, vector<8x16xf32>,
    %43 = vector.extract_strided_slice %5 {offsets = [0, 16], sizes = [16, 16], strides = [1, 1]} : vector<16x96xf32> to vector<16x16xf32>
    %44 = vector.extract_strided_slice %5 {offsets = [0, 48], sizes = [16, 16], strides = [1, 1]} : vector<16x96xf32> to vector<16x16xf32>
    %45 = vector.extract_strided_slice %5 {offsets = [0, 80], sizes = [16, 16], strides = [1, 1]} : vector<16x96xf32> to vector<16x16xf32>
    %46 = vector.extract_strided_slice %43 {offsets = [0, 0], sizes = [8, 16], strides = [1, 1]} : vector<16x16xf32> to vector<8x16xf32>
    %47 = vector.extract_strided_slice %44 {offsets = [0, 0], sizes = [8, 16], strides = [1, 1]} : vector<16x16xf32> to vector<8x16xf32>
    %48 = vector.extract_strided_slice %45 {offsets = [0, 0], sizes = [8, 16], strides = [1, 1]} : vector<16x16xf32> to vector<8x16xf32>
    %cst_18 = arith.constant dense<0.000000e+00> : vector<8x8xf32>
    %49 = tpu.matmul %46, %47, %cst_18 {dimension_numbers = #tpu.dot_dimension_numbers<[1], [1], [0], [0], [0, 0, 1, 0], [], []>, precision = #tpu.contract_precision<fp32>} : vector<8x16xf32>, vector<8x16xf32>, vector<8x8xf32> -> vector<8x8xf32>
    %cst_19 = arith.constant 2.500000e-01 : f32
    %50 = vector.broadcast %cst_19 : f32 to vector<8x8xf32>
    %51 = arith.mulf %49, %50 : vector<8x8xf32>
    %cst_20 = arith.constant dense<0xFF800000> : vector<8xf32>
    %52 = vector.multi_reduction <maximumf>, %51, %cst_20 [1] : vector<8x8xf32> to vector<8xf32>
    %53 = vector.shape_cast %52 : vector<8xf32> to vector<8x1xf32>
    %54 = vector.broadcast %53 : vector<8x1xf32> to vector<8x8xf32>
    %55 = arith.subf %51, %54 : vector<8x8xf32>
    %56 = math.exp %55 : vector<8x8xf32>
    %cst_21 = arith.constant dense<0.000000e+00> : vector<8xf32>
    %57 = vector.multi_reduction <add>, %56, %cst_21 [1] : vector<8x8xf32> to vector<8xf32>
    %58 = vector.shape_cast %57 : vector<8xf32> to vector<8x1xf32>
    %59 = vector.broadcast %58 : vector<8x1xf32> to vector<8x8xf32>
    %60 = arith.divf %56, %59 : vector<8x8xf32>
    %cst_22 = arith.constant dense<0.000000e+00> : vector<8x16xf32>
    %61 = tpu.matmul %60, %48, %cst_22 {dimension_numbers = #tpu.dot_dimension_numbers<[1], [0], [0], [1], [0, 0, 1, 1], [], []>, precision = #tpu.contract_precision<fp32>} : vector<8x8xf32>, vector<8x16xf32>, vector<8x16xf32> -> vector<8x16xf32>
    %c0_23 = arith.constant 0 : index
    %c16 = arith.constant 16 : index
    %62 = vector.load %arg15[%c0_23, %c16] : memref<16x32xf32, #tpu.memory_space<vmem>>, vector<8x16xf32>
    tpu.vector_store %arg15[%c0_23, %c16], %61 {strides = array<i32>} : memref<16x32xf32, #tpu.memory_space<vmem>>, vector<8x16xf32>,
    %63 = vector.extract_strided_slice %43 {offsets = [8, 0], sizes = [8, 16], strides = [1, 1]} : vector<16x16xf32> to vector<8x16xf32>
    %64 = vector.extract_strided_slice %44 {offsets = [8, 0], sizes = [8, 16], strides = [1, 1]} : vector<16x16xf32> to vector<8x16xf32>
    %65 = vector.extract_strided_slice %45 {offsets = [8, 0], sizes = [8, 16], strides = [1, 1]} : vector<16x16xf32> to vector<8x16xf32>
    %cst_24 = arith.constant dense<0.000000e+00> : vector<8x8xf32>
    %66 = tpu.matmul %63, %64, %cst_24 {dimension_numbers = #tpu.dot_dimension_numbers<[1], [1], [0], [0], [0, 0, 1, 0], [], []>, precision = #tpu.contract_precision<fp32>} : vector<8x16xf32>, vector<8x16xf32>, vector<8x8xf32> -> vector<8x8xf32>
    %cst_25 = arith.constant 2.500000e-01 : f32
    %67 = vector.broadcast %cst_25 : f32 to vector<8x8xf32>
    %68 = arith.mulf %66, %67 : vector<8x8xf32>
    %cst_26 = arith.constant dense<0xFF800000> : vector<8xf32>
    %69 = vector.multi_reduction <maximumf>, %68, %cst_26 [1] : vector<8x8xf32> to vector<8xf32>
    %70 = vector.shape_cast %69 : vector<8xf32> to vector<8x1xf32>
    %71 = vector.broadcast %70 : vector<8x1xf32> to vector<8x8xf32>
    %72 = arith.subf %68, %71 : vector<8x8xf32>
    %73 = math.exp %72 : vector<8x8xf32>
    %cst_27 = arith.constant dense<0.000000e+00> : vector<8xf32>
    %74 = vector.multi_reduction <add>, %73, %cst_27 [1] : vector<8x8xf32> to vector<8xf32>
    %75 = vector.shape_cast %74 : vector<8xf32> to vector<8x1xf32>
    %76 = vector.broadcast %75 : vector<8x1xf32> to vector<8x8xf32>
    %77 = arith.divf %73, %76 : vector<8x8xf32>
    %cst_28 = arith.constant dense<0.000000e+00> : vector<8x16xf32>
    %78 = tpu.matmul %77, %65, %cst_28 {dimension_numbers = #tpu.dot_dimension_numbers<[1], [0], [0], [1], [0, 0, 1, 1], [], []>, precision = #tpu.contract_precision<fp32>} : vector<8x8xf32>, vector<8x16xf32>, vector<8x16xf32> -> vector<8x16xf32>
    %c8_29 = arith.constant 8 : index
    %c16_30 = arith.constant 16 : index
    %79 = vector.load %arg15[%c8_29, %c16_30] : memref<16x32xf32, #tpu.memory_space<vmem>>, vector<8x16xf32>
    tpu.vector_store %arg15[%c8_29, %c16_30], %78 {strides = array<i32>} : memref<16x32xf32, #tpu.memory_space<vmem>>, vector<8x16xf32>,
    %c0_31 = arith.constant 0 : index
    %c0_32 = arith.constant 0 : index
    %80 = vector.load %arg15[%c0_31, %c0_32] : memref<16x32xf32, #tpu.memory_space<vmem>>, vector<16x32xf32>
    %c0_33 = arith.constant 0 : index
    %c0_34 = arith.constant 0 : index
    %81 = vector.load %arg4[%c0_33, %c0_34] : memref<32x32xf32, #tpu.memory_space<vmem>>, vector<32x32xf32>
    %cst_35 = arith.constant dense<0.000000e+00> : vector<16x32xf32>
    %82 = tpu.matmul %80, %81, %cst_35 {dimension_numbers = #tpu.dot_dimension_numbers<[1], [0], [0], [1], [0, 0, 1, 1], [], []>, precision = #tpu.contract_precision<fp32>} : vector<16x32xf32>, vector<32x32xf32>, vector<16x32xf32> -> vector<16x32xf32>
    %c0_36 = arith.constant 0 : index
    %c0_37 = arith.constant 0 : index
    %83 = vector.load %arg5[%c0_36, %c0_37] : memref<1x32xf32, #tpu.memory_space<vmem>>, vector<1x32xf32>
    %84 = vector.broadcast %83 : vector<1x32xf32> to vector<16x32xf32>
    %85 = arith.addf %82, %84 : vector<16x32xf32>
    %86 = arith.addf %85, %0 : vector<16x32xf32>
    %c0_38 = arith.constant 0 : index
    %c0_39 = arith.constant 0 : index
    %87 = vector.load %arg6[%c0_38, %c0_39] : memref<1x32xf32, #tpu.memory_space<vmem>>, vector<1x32xf32>
    %c0_40 = arith.constant 0 : index
    %c0_41 = arith.constant 0 : index
    %88 = vector.load %arg7[%c0_40, %c0_41] : memref<1x32xf32, #tpu.memory_space<vmem>>, vector<1x32xf32>
    %cst_42 = arith.constant dense<0.000000e+00> : vector<16xf32>
    %89 = vector.multi_reduction <add>, %86, %cst_42 [1] : vector<16x32xf32> to vector<16xf32>
    %90 = vector.shape_cast %89 : vector<16xf32> to vector<16x1xf32>
    %cst_43 = arith.constant 3.200000e+01 : f32
    %91 = vector.broadcast %cst_43 : f32 to vector<16x1xf32>
    %92 = arith.divf %90, %91 : vector<16x1xf32>
    %93 = vector.broadcast %92 : vector<16x1xf32> to vector<16x32xf32>
    %94 = arith.subf %86, %93 : vector<16x32xf32>
    %95 = arith.mulf %94, %94 : vector<16x32xf32>
    %cst_44 = arith.constant dense<0.000000e+00> : vector<16xf32>
    %96 = vector.multi_reduction <add>, %95, %cst_44 [1] : vector<16x32xf32> to vector<16xf32>
    %97 = vector.shape_cast %96 : vector<16xf32> to vector<16x1xf32>
    %cst_45 = arith.constant 3.200000e+01 : f32
    %98 = vector.broadcast %cst_45 : f32 to vector<16x1xf32>
    %99 = arith.divf %97, %98 : vector<16x1xf32>
    %100 = vector.broadcast %92 : vector<16x1xf32> to vector<16x32xf32>
    %101 = arith.subf %86, %100 : vector<16x32xf32>
    %cst_46 = arith.constant 9.99999974E-6 : f32
    %102 = vector.broadcast %cst_46 : f32 to vector<16x1xf32>
    %103 = arith.addf %99, %102 : vector<16x1xf32>
    %104 = math.rsqrt %103 : vector<16x1xf32>
    %105 = vector.broadcast %104 : vector<16x1xf32> to vector<16x32xf32>
    %106 = arith.mulf %101, %105 : vector<16x32xf32>
    %107 = vector.broadcast %87 : vector<1x32xf32> to vector<16x32xf32>
    %108 = arith.mulf %106, %107 : vector<16x32xf32>
    %109 = vector.broadcast %88 : vector<1x32xf32> to vector<16x32xf32>
    %110 = arith.addf %108, %109 : vector<16x32xf32>
    %c0_47 = arith.constant 0 : index
    %c0_48 = arith.constant 0 : index
    %111 = vector.load %arg8[%c0_47, %c0_48] : memref<32x64xf32, #tpu.memory_space<vmem>>, vector<32x64xf32>
    %cst_49 = arith.constant dense<0.000000e+00> : vector<16x64xf32>
    %112 = tpu.matmul %110, %111, %cst_49 {dimension_numbers = #tpu.dot_dimension_numbers<[1], [0], [0], [1], [0, 0, 1, 1], [], []>, precision = #tpu.contract_precision<fp32>} : vector<16x32xf32>, vector<32x64xf32>, vector<16x64xf32> -> vector<16x64xf32>
    %c0_50 = arith.constant 0 : index
    %c0_51 = arith.constant 0 : index
    %113 = vector.load %arg9[%c0_50, %c0_51] : memref<1x64xf32, #tpu.memory_space<vmem>>, vector<1x64xf32>
    %114 = vector.broadcast %113 : vector<1x64xf32> to vector<16x64xf32>
    %115 = arith.addf %112, %114 : vector<16x64xf32>
    %cst_52 = arith.constant 0.000000e+00 : f32
    %116 = vector.broadcast %cst_52 : f32 to vector<16x64xf32>
    %117 = arith.maximumf %115, %116 : vector<16x64xf32>
    %c0_53 = arith.constant 0 : index
    %c0_54 = arith.constant 0 : index
    %118 = vector.load %arg10[%c0_53, %c0_54] : memref<64x32xf32, #tpu.memory_space<vmem>>, vector<64x32xf32>
    %cst_55 = arith.constant dense<0.000000e+00> : vector<16x32xf32>
    %119 = tpu.matmul %117, %118, %cst_55 {dimension_numbers = #tpu.dot_dimension_numbers<[1], [0], [0], [1], [0, 0, 1, 1], [], []>, precision = #tpu.contract_precision<fp32>} : vector<16x64xf32>, vector<64x32xf32>, vector<16x32xf32> -> vector<16x32xf32>
    %c0_56 = arith.constant 0 : index
    %c0_57 = arith.constant 0 : index
    %120 = vector.load %arg11[%c0_56, %c0_57] : memref<1x32xf32, #tpu.memory_space<vmem>>, vector<1x32xf32>
    %121 = vector.broadcast %120 : vector<1x32xf32> to vector<16x32xf32>
    %122 = arith.addf %119, %121 : vector<16x32xf32>
    %123 = arith.addf %122, %110 : vector<16x32xf32>
    %c0_58 = arith.constant 0 : index
    %c0_59 = arith.constant 0 : index
    %124 = vector.load %arg12[%c0_58, %c0_59] : memref<1x32xf32, #tpu.memory_space<vmem>>, vector<1x32xf32>
    %c0_60 = arith.constant 0 : index
    %c0_61 = arith.constant 0 : index
    %125 = vector.load %arg13[%c0_60, %c0_61] : memref<1x32xf32, #tpu.memory_space<vmem>>, vector<1x32xf32>
    %cst_62 = arith.constant dense<0.000000e+00> : vector<16xf32>
    %126 = vector.multi_reduction <add>, %123, %cst_62 [1] : vector<16x32xf32> to vector<16xf32>
    %127 = vector.shape_cast %126 : vector<16xf32> to vector<16x1xf32>
    %cst_63 = arith.constant 3.200000e+01 : f32
    %128 = vector.broadcast %cst_63 : f32 to vector<16x1xf32>
    %129 = arith.divf %127, %128 : vector<16x1xf32>
    %130 = vector.broadcast %129 : vector<16x1xf32> to vector<16x32xf32>
    %131 = arith.subf %123, %130 : vector<16x32xf32>
    %132 = arith.mulf %131, %131 : vector<16x32xf32>
    %cst_64 = arith.constant dense<0.000000e+00> : vector<16xf32>
    %133 = vector.multi_reduction <add>, %132, %cst_64 [1] : vector<16x32xf32> to vector<16xf32>
    %134 = vector.shape_cast %133 : vector<16xf32> to vector<16x1xf32>
    %cst_65 = arith.constant 3.200000e+01 : f32
    %135 = vector.broadcast %cst_65 : f32 to vector<16x1xf32>
    %136 = arith.divf %134, %135 : vector<16x1xf32>
    %137 = vector.broadcast %129 : vector<16x1xf32> to vector<16x32xf32>
    %138 = arith.subf %123, %137 : vector<16x32xf32>
    %cst_66 = arith.constant 9.99999974E-6 : f32
    %139 = vector.broadcast %cst_66 : f32 to vector<16x1xf32>
    %140 = arith.addf %136, %139 : vector<16x1xf32>
    %141 = math.rsqrt %140 : vector<16x1xf32>
    %142 = vector.broadcast %141 : vector<16x1xf32> to vector<16x32xf32>
    %143 = arith.mulf %138, %142 : vector<16x32xf32>
    %144 = vector.broadcast %124 : vector<1x32xf32> to vector<16x32xf32>
    %145 = arith.mulf %143, %144 : vector<16x32xf32>
    %146 = vector.broadcast %125 : vector<1x32xf32> to vector<16x32xf32>
    %147 = arith.addf %145, %146 : vector<16x32xf32>
    %c0_67 = arith.constant 0 : index
    %c0_68 = arith.constant 0 : index
    %148 = vector.load %arg14[%c0_67, %c0_68] : memref<16x32xf32, #tpu.memory_space<vmem>>, vector<16x32xf32>
    tpu.vector_store %arg14[%c0_67, %c0_68], %147 {strides = array<i32>} : memref<16x32xf32, #tpu.memory_space<vmem>>, vector<16x32xf32>,
    return
  }
  func.func @transform_0(%arg0: i32) -> (i32, i32) {
    %c0_i32 = arith.constant 0 : i32
    %c0_i32_0 = arith.constant 0 : i32
    %c0_i32_1 = arith.constant 0 : i32
    return %c0_i32, %c0_i32_0 : i32, i32
  }
  func.func @transform_1(%arg0: i32) -> (i32, i32) {
    %c0_i32 = arith.constant 0 : i32
    %c0_i32_0 = arith.constant 0 : i32
    %c0_i32_1 = arith.constant 0 : i32
    return %c0_i32, %c0_i32_0 : i32, i32
  }
  func.func @transform_2(%arg0: i32) -> (i32, i32) {
    %c0_i32 = arith.constant 0 : i32
    %c0_i32_0 = arith.constant 0 : i32
    %c0_i32_1 = arith.constant 0 : i32
    return %c0_i32, %c0_i32_0 : i32, i32
  }
  func.func @transform_3(%arg0: i32) -> (i32, i32) {
    %c0_i32 = arith.constant 0 : i32
    %c0_i32_0 = arith.constant 0 : i32
    %c0_i32_1 = arith.constant 0 : i32
    return %c0_i32, %c0_i32_0 : i32, i32
  }
  func.func @transform_4(%arg0: i32) -> (i32, i32) {
    %c0_i32 = arith.constant 0 : i32
    %c0_i32_0 = arith.constant 0 : i32
    %c0_i32_1 = arith.constant 0 : i32
    return %c0_i32, %c0_i32_0 : i32, i32
  }
  func.func @transform_5(%arg0: i32) -> (i32, i32) {
    %c0_i32 = arith.constant 0 : i32
    %c0_i32_0 = arith.constant 0 : i32
    %c0_i32_1 = arith.constant 0 : i32
    return %c0_i32, %c0_i32_0 : i32, i32
  }
  func.func @transform_6(%arg0: i32) -> (i32, i32) {
    %c0_i32 = arith.constant 0 : i32
    %c0_i32_0 = arith.constant 0 : i32
    %c0_i32_1 = arith.constant 0 : i32
    return %c0_i32, %c0_i32_0 : i32, i32
  }
  func.func @transform_7(%arg0: i32) -> (i32, i32) {
    %c0_i32 = arith.constant 0 : i32
    %c0_i32_0 = arith.constant 0 : i32
    %c0_i32_1 = arith.constant 0 : i32
    return %c0_i32, %c0_i32_0 : i32, i32
  }
  func.func @transform_8(%arg0: i32) -> (i32, i32) {
    %c0_i32 = arith.constant 0 : i32
    %c0_i32_0 = arith.constant 0 : i32
    %c0_i32_1 = arith.constant 0 : i32
    return %c0_i32, %c0_i32_0 : i32, i32
  }
  func.func @transform_9(%arg0: i32) -> (i32, i32) {
    %c0_i32 = arith.constant 0 : i32
    %c0_i32_0 = arith.constant 0 : i32
    %c0_i32_1 = arith.constant 0 : i32
    return %c0_i32, %c0_i32_0 : i32, i32
  }
  func.func @transform_10(%arg0: i32) -> (i32, i32) {
    %c0_i32 = arith.constant 0 : i32
    %c0_i32_0 = arith.constant 0 : i32
    %c0_i32_1 = arith.constant 0 : i32
    return %c0_i32, %c0_i32_0 : i32, i32
  }
  func.func @transform_11(%arg0: i32) -> (i32, i32) {
    %c0_i32 = arith.constant 0 : i32
    %c0_i32_0 = arith.constant 0 : i32
    %c0_i32_1 = arith.constant 0 : i32
    return %c0_i32, %c0_i32_0 : i32, i32
  }
  func.func @transform_12(%arg0: i32) -> (i32, i32) {
    %c0_i32 = arith.constant 0 : i32
    %c0_i32_0 = arith.constant 0 : i32
    %c0_i32_1 = arith.constant 0 : i32
    return %c0_i32, %c0_i32_0 : i32, i32
  }
  func.func @transform_13(%arg0: i32) -> (i32, i32) {
    %c0_i32 = arith.constant 0 : i32
    %c0_i32_0 = arith.constant 0 : i32
    %c0_i32_1 = arith.constant 0 : i32
    return %c0_i32, %c0_i32_0 : i32, i32
  }
}

</mosaic_0001>

<bundles_post_ra>
// kernel: tpu_custom_call.1
= control target key start
LH: loop header
LB: loop body
LE: loop exit
PB: predicated region body
PF: predicated region fallthrough
CT: control target
= control target key end

     0   :  { %18 = vsyncpa [#allocation4], 0  ;;  %s7792_s0 = inlined_call_operand.hbm [shape: f32[16,32], index: 0, kind: input, shape index: {}]   ;;  %s7793_s1 = inlined_call_operand.vmem [shape: f32[32,96], index: 1, kind: input, shape index: {}]   ;;  %s7794_s2 = inlined_call_operand.vmem [shape: f32[1,96], index: 2, kind: input, shape index: {}]   ;;  %s7795_s3 = inlined_call_operand.vmem [shape: f32[32,32], index: 3, kind: input, shape index: {}]   ;;  %s7796_s4 = inlined_call_operand.vmem [shape: f32[1,32], index: 4, kind: input, shape index: {}]   ;;  %s7797_s5 = inlined_call_operand.vmem [shape: f32[1,32], index: 5, kind: input, shape index: {}]   ;;  %s7798_s6 = inlined_call_operand.vmem [shape: f32[1,32], index: 6, kind: input, shape index: {}]   ;;  %s7799_s7 = inlined_call_operand.vmem [shape: f32[32,64], index: 7, kind: input, shape index: {}]   ;;  %s7800_s8 = inlined_call_operand.vmem [shape: f32[1,64], index: 8, kind: input, shape index: {}]   ;;  %s7801_s9 = inlined_call_operand.vmem [shape: f32[64,32], index: 9, kind: input, shape index: {}]   ;;  %s7802_s10 = inlined_call_operand.vmem [shape: f32[1,32], index: 10, kind: input, shape index: {}]   ;;  %s7803_s11 = inlined_call_operand.vmem [shape: f32[1,32], index: 11, kind: input, shape index: {}]   ;;  %s7804_s12 = inlined_call_operand.vmem [shape: f32[1,32], index: 12, kind: input, shape index: {}]   ;;  %s7805_s13 = inlined_call_operand.hbm [shape: f32[16,32], index: 13, kind: output, shape index: {}]  }
   0x1   :  { %19 = vsyncpa [#allocation5], 0  ;;  %s7006_s25 = smov [#allocation3]  }
   0x2   :  { %s25_s26 = sshll.u32 %s7006_s25, 4  ;;  %s26_s26 = int_to_ptr.vmem [resolvable:$true] %s25_s26 }
   0x3   :  { %s6970_s27 = scalar_lea.vmem %s26_s26, 256  ;;  %p6975_p1 = scmp.lt.s32.totalorder %s26_s26, %s26_s26 }
   0x4   :  { %p6971_p0 = scmp.ne.s32.totalorder %s26_s26, %s6970_s27  ;;  %p6976_p2 = scmp.lt.s32.totalorder %s6970_s27, %s6970_s27 }
   0x6   :  { %p6977_p3 = por %p6976_p2, %p6975_p1 }
   0x8   :  { %p6978_p4 = pnand %p6977_p3, %p6971_p0 }
   0xa   :  { %6981 = shalt.err (!%p6978_p4)
}
   0xb   :  { %s7007_s28 = smov 128   ;;  %s7008_s29 = smov 8  }
   0xc   :  { %31 = dma.hbm_to_vmem [thread:$0]  %s7792_s0, 256, %s26_s26, [#allocation4], %s7007_s28, %s7007_s28, %s7008_s29  }
   0xd   :  { %7002 = dma.done.wait [#allocation4], 256  }
   0xe   :  { %7003 = vsyncadd [#allocation4], 4294967040  ;;  %vm72_vm0 = vcmask 261120   ;;  %v64_v0 = vld [vmem:[%s7793_s1 + $0x18] sm:$0xff]  ;;  %v63_v1 = vld [vmem:[%s7793_s1 + $0x10] sm:$0xff]  ;;  %v7009_v55 = vmov 0.0  }
   0xf   :  { %v62_v2 = vld [vmem:[%s7793_s1 + $0x8] sm:$0xff]  ;;  %v7103_v3 = vand.u32 4294901760, %v64_v0  ;;  %v7105_v4 = vand.u32 4294901760, %v63_v1  ;;  %v61_v6 = vld [vmem:[%s7793_s1] sm:$0xff]  ;;  %v59_v7 = vld [vmem:[#allocation3] sm:$0xff]  ;;  %vm7010_vm1 = vmmov 0  }
  0x10   :  { %v7107_v5 = vand.u32 4294901760, %v62_v2  ;;  %v60_v8 = vld [vmem:[#allocation3 + $0x8] sm:$0xff]  ;;  %v7112_v9 = vand.u32 4294901760, %v61_v6  ;;  %v74_v10 = vsel %vm72_vm0, %v59_v7, 0  ;;  %v6100_v38 = vld [vmem:[%s7794_s2] ss:$0 sm:$0xff] }
  0x11   :  { %v77_v11 = vsel %vm72_vm0, %v60_v8, 0  ;;  %6372 = vmatprep.subr.mxu0 %v7103_v3  ;;  %v194_v12 = vsub.f32 %v64_v0, %v7103_v3  ;;  %v7118_v13 = vand.u32 4294901760, %v74_v10  ;;  %v201_v14 = vsub.f32 %v63_v1, %v7105_v4  ;;  %s7011_s2 = smov 96   ;;  %s7012_s23 = smov 64  }
  0x12   :  { %v7121_v15 = vand.u32 4294901760, %v77_v11  ;;  %6373 = vmatpush3.msra.mxu0 %v7103_v3  ;;  %v208_v16 = vsub.f32 %v62_v2, %v7107_v5  ;;  %v215_v17 = vsub.f32 %v61_v6, %v7112_v9  ;;  %vm610_vm2 = vcmask 130048   ;;  %s7013_s24 = smov 112   ;;  %s7014_s25 = smov 80  }
  0x13   :  { %6374 = vmatprep.subr.mxu0 %v7105_v4  ;;  %v195_v18 = vand.u32 4294901760, %v194_v12  ;;  %v149_v19 = vsub.f32 %v74_v10, %v7118_v13  ;;  %v202_v20 = vand.u32 4294901760, %v201_v14  ;;  %6391 = vmatprep.mubr.f32.mxu1 %v7118_v13  ;;  %vm1062_vm3 = vcmask 64512   ;;  %s7015_s26 = smov 48   ;;  %s7016_s27 = smov 16  }
  0x14   :  { %v159_v21 = vsub.f32 %v77_v11, %v7121_v15  ;;  %6375 = vmatpush3.msra.mxu0 %v7105_v4  ;;  %v209_v22 = vand.u32 4294901760, %v208_v16  ;;  %v216_v23 = vand.u32 4294901760, %v215_v17  ;;  %vm3367_vm4 = vcmask 261248  }
  0x15   :  { %6376 = vmatprep.subr.mxu0 %v7107_v5  ;;  %v196_v24 = vsub.f32 %v194_v12, %v195_v18  ;;  %v150_v25 = vand.u32 4294901760, %v149_v19  ;;  %v203_v26 = vsub.f32 %v201_v14, %v202_v20  ;;  %vm5448_vm5 = vcmask 523264  }
  0x16   :  { %v160_v27 = vand.u32 4294901760, %v159_v21  ;;  %6377 = vmatpush3.msra.mxu0 %v7107_v5  ;;  %v210_v28 = vsub.f32 %v208_v16, %v209_v22  ;;  %v217_v29 = vsub.f32 %v215_v17, %v216_v23 }
  0x17   :  { %6378 = vmatprep.subr.mxu0 %v7112_v9  ;;  %v197_v30 = vand.u32 4294901760, %v196_v24  ;;  %v151_v31 = vsub.f32 %v149_v19, %v150_v25  ;;  %v204_v32 = vand.u32 4294901760, %v203_v26 }
  0x18   :  { %v161_v33 = vsub.f32 %v159_v21, %v160_v27  ;;  %6379 = vmatpush3.msra.mxu0 %v7112_v9  ;;  %v211_v36 = vand.u32 4294901760, %v210_v28  ;;  %v218_v37 = vand.u32 4294901760, %v217_v29 }
  0x19   :  { %6383 = vmatprep.subr.mxu1 %v197_v30  ;;  %v152_v34 = vand.u32 4294901760, %v151_v31  ;;  %6394 = vmatprep.subr.mxu0 %v194_v12 }
  0x1a   :  { %v162_v35 = vand.u32 4294901760, %v161_v33  ;;  %6384 = vmatpush3.msra.mxu1 %v197_v30 }
  0x1b   :  { %6380 = vmatprep.mubr.f32.mxu0 %v152_v34  ;;  %6385 = vmatprep.subr.mxu1 %v204_v32 }
  0x1c   :  { %6381 = vmatmul.mubr.f32.vlgmr.msra.gmra.mxu0 %v162_v35  ;;  %6386 = vmatpush3.msra.mxu1 %v204_v32 }
  0x1d   :  { %6395 = vmatpush3.msra.mxu0 %v194_v12  ;;  %6387 = vmatprep.subr.mxu1 %v211_v36 }
  0x1e   :  { %6396 = vmatprep.subr.mxu0 %v201_v14  ;;  %6388 = vmatpush3.msra.mxu1 %v211_v36 }
  0x1f   :  { %6397 = vmatpush3.msra.mxu0 %v201_v14  ;;  %6389 = vmatprep.subr.mxu1 %v218_v37 }
  0x20   :  { %6398 = vmatprep.subr.mxu0 %v208_v16  ;;  %6390 = vmatpush3.msra.mxu1 %v218_v37 }
  0x21   :  { %6399 = vmatpush3.msra.mxu0 %v208_v16  ;;  %6392 = vmatmul.mubr.f32.vlgmr.msra.gmra.mxu1 %v7121_v15 }
  0x22   :  { %6400 = vmatprep.subr.mxu0 %v215_v17  ;;  %6405 = vmatprep.subr.mxu1 %v7103_v3 }
  0x23   :  { %6401 = vmatpush3.msra.mxu0 %v215_v17  ;;  %6402 = vmatprep.mubr.f32.mxu0 %v149_v19 }
  0x24   :  { %6406 = vmatpush3.msra.mxu1 %v7103_v3  ;;  %6403 = vmatmul.mubr.f32.vlgmr.msra.gmra.mxu0 %v159_v21 }
  0x25   :  { %6407 = vmatprep.subr.mxu1 %v7105_v4  ;;  %6416 = vmatprep.subr.mxu0 %v195_v18 }
  0x26   :  { %6408 = vmatpush3.msra.mxu1 %v7105_v4  ;;  %6417 = vmatpush3.msra.mxu0 %v195_v18 }
  0x27   :  { %6409 = vmatprep.subr.mxu1 %v7107_v5  ;;  %6418 = vmatprep.subr.mxu0 %v202_v20 }
  0x28   :  { %6410 = vmatpush3.msra.mxu1 %v7107_v5  ;;  %6419 = vmatpush3.msra.mxu0 %v202_v20 }
  0x29   :  { %6411 = vmatprep.subr.mxu1 %v7112_v9  ;;  %6420 = vmatprep.subr.mxu0 %v209_v22 }
  0x2a   :  { %6412 = vmatpush3.msra.mxu1 %v7112_v9  ;;  %6413 = vmatprep.mubr.f32.mxu1 %v150_v25 }
  0x2b   :  { %6421 = vmatpush3.msra.mxu0 %v209_v22  ;;  %6414 = vmatmul.mubr.f32.vlgmr.msra.gmra.mxu1 %v160_v27 }
  0x2c   :  { %6422 = vmatprep.subr.mxu0 %v216_v23  ;;  %6427 = vmatprep.subr.mxu1 %v7103_v3 }
  0x2d   :  { %6423 = vmatpush3.msra.mxu0 %v216_v23  ;;  %6424 = vmatprep.mubr.f32.mxu0 %v7118_v13 }
  0x2e   :  { %6428 = vmatpush3.msra.mxu1 %v7103_v3  ;;  %6425 = vmatmul.mubr.f32.vlgmr.msra.gmra.mxu0 %v7121_v15 }
  0x2f   :  { %6429 = vmatprep.subr.mxu1 %v7105_v4  ;;  %6435 = vmatprep.mubr.f32.mxu1 %v7118_v13 }
  0x30   :  { %6430 = vmatpush3.msra.mxu1 %v7105_v4  ;;  %6438 = vmatprep.subr.mxu0 %v7009_v55 }
  0x31   :  { %6431 = vmatprep.subr.mxu1 %v7107_v5  ;;  %6440 = vmatprep.mubr.msk.f32.mxu0 %vm7010_vm1, %v7009_v55 }
  0x32   :  { %6432 = vmatpush3.msra.mxu1 %v7107_v5 }
  0x33   :  { %6433 = vmatprep.subr.mxu1 %v7112_v9 }
  0x34   :  { %6434 = vmatpush3.msra.mxu1 %v7112_v9 }
  0x35   :  { %6436 = vmatmul.mubr.f32.vlgmr.msra.gmra.mxu1 %v7121_v15  ;;  %6443 = vmatprep.subr.mxu1 %v7009_v55 }
  0x36   :  { %6445 = vmatprep.mubr.msk.f32.mxu1 %vm7010_vm1, %v7009_v55 }
  0xdc   :  { %v6382_v39 = vpop.f32.mrf.mxu0 }
  0xdd   :  { %v165_v40 = vadd.f32 %v6382_v39, %v6100_v38 }
  0xde   :  { %v154_v41 = vpop.f32.mrf.mxu0 }
  0xdf   :  { %v155_v46 = vadd.f32 %v6100_v38, %v154_v41 }
  0xe1   :  { %v6393_v42 = vpop.f32.mrf.mxu1 }
  0xe2   :  { %v262_v43 = vadd.f32 %v6393_v42, %v165_v40 }
  0xe3   :  { %v255_v47 = vpop.f32.mrf.mxu1 }
  0xe4   :  { %v6404_v44 = vpop.f32.mrf.mxu0  ;;  %v256_v49 = vadd.f32 %v255_v47, %v155_v46 }
  0xe5   :  { %v349_v45 = vadd.f32 %v6404_v44, %v262_v43 }
  0xe6   :  { %v341_v50 = vpop.f32.mrf.mxu0 }
  0xe7   :  { %v342_v56 = vadd.f32 %v341_v50, %v256_v49 }
  0xeb   :  { %v6415_v48 = vpop.f32.mrf.mxu1 }
  0xec   :  { %v434_v51 = vadd.f32 %v6415_v48, %v349_v45 }
  0xed   :  { %v425_v53 = vpop.f32.mrf.mxu1 }
  0xee   :  { %v6426_v52 = vpop.f32.mrf.mxu0  ;;  %v426_v57 = vadd.f32 %v425_v53, %v342_v56 }
  0xef   :  { %v523_v54 = vadd.f32 %v6426_v52, %v434_v51 }
  0xf0   :  { %v516_v58 = vpop.f32.mrf.mxu0 }
  0xf1   :  { %v517_v60 = vadd.f32 %v516_v58, %v426_v57 }
  0xf5   :  { %v6437_v59 = vpop.f32.mrf.mxu1 }
  0xf6   :  { %v7165_v61 = vadd.f32 %v6437_v59, %v523_v54 }
  0xf7   :  { %v597_v62 = vpop.f32.mrf.mxu1 }
  0xf8   :  { %v7167_v63 = vadd.f32 %v597_v62, %v517_v60  ;;  %v1530_v53 = vsel %vm610_vm2, %v7165_v61, 0 }
  0xf9   :  { %v1600_v57 = vand.u32 4294901760, %v1530_v53 }
  0xfa   :  { %608 = vrot.lane.b32.xlu0 %v7167_v63, %s7011_s2  ;;  %v611_v0 = vsel %vm610_vm2, %v7167_v63, 0 }
  0xfb   :  { %v681_v1 = vand.u32 4294901760, %v611_v0  ;;  %v1601_v62 = vsub.f32 %v1530_v53, %v1600_v57 }
  0xfd   :  { %v682_v2 = vsub.f32 %v611_v0, %v681_v1 }
  0xff   :  { %v683_v3 = vand.u32 4294901760, %v682_v2 }
 0x101   :  { %v684_v6 = vsub.f32 %v682_v2, %v683_v3 }
 0x103   :  { %v685_v9 = vand.u32 4294901760, %v684_v6 }
 0x16c   :  { %v609_v4 = vpop.permute.xlu0 %608 }
 0x16d   :  { %v613_v5 = vsel %vm610_vm2, %v609_v4, 0 }
 0x16e   :  { %v646_v7 = vand.u32 4294901760, %v613_v5 }
 0x170   :  { %v723_v8 = vsub.f32 %v613_v5, %v646_v7  ;;  %6439 = vmatpush3.xpose.msra.mxu0 %v646_v7 }
 0x171   :  { %6448 = vmatprep.subr.mxu0 %v7009_v55 }
 0x172   :  { %v724_v10 = vand.u32 4294901760, %v723_v8 }
 0x173   :  { %6441 = vmatmul.mubr.f32.vlgmr.msra.gmra.mxu0 %v685_v9 }
 0x174   :  { %v725_v11 = vsub.f32 %v723_v8, %v724_v10  ;;  %6449 = vmatpush3.xpose.msra.mxu0 %v723_v8  ;;  %6450 = vmatprep.mubr.msk.f32.mxu0 %vm7010_vm1, %v7009_v55 }
 0x175   :  { %6458 = vmatprep.subr.mxu0 %v7009_v55 }
 0x176   :  { %v726_v12 = vand.u32 4294901760, %v725_v11 }
 0x177   :  { %6451 = vmatmul.mubr.f32.vlgmr.msra.gmra.mxu0 %v682_v2 }
 0x178   :  { %6444 = vmatpush3.xpose.msra.mxu1 %v726_v12  ;;  %6459 = vmatpush3.xpose.msra.mxu0 %v724_v10 }
 0x179   :  { %6460 = vmatprep.mubr.msk.f32.mxu0 %vm7010_vm1, %v7009_v55  ;;  %6453 = vmatprep.subr.mxu1 %v7009_v55 }
 0x17a   :  { %6468 = vmatprep.subr.mxu0 %v7009_v55 }
 0x17b   :  { %6446 = vmatmul.mubr.f32.vlgmr.msra.gmra.mxu1 %v681_v1  ;;  %6461 = vmatmul.mubr.f32.vlgmr.msra.gmra.mxu0 %v681_v1 }
 0x17c   :  { %6454 = vmatpush3.xpose.msra.mxu1 %v646_v7  ;;  %6455 = vmatprep.mubr.msk.f32.mxu1 %vm7010_vm1, %v7009_v55 }
 0x17d   :  { %6463 = vmatprep.subr.mxu1 %v7009_v55  ;;  %6470 = vmatprep.mubr.msk.f32.mxu0 %vm7010_vm1, %v7009_v55 }
 0x17f   :  { %6456 = vmatmul.mubr.f32.vlgmr.msra.gmra.mxu1 %v683_v3 }
 0x180   :  { %6464 = vmatpush3.xpose.msra.mxu1 %v646_v7  ;;  %6465 = vmatprep.mubr.msk.f32.mxu1 %vm7010_vm1, %v7009_v55 }
 0x181   :  { %6473 = vmatprep.subr.mxu1 %v7009_v55 }
 0x183   :  { %6466 = vmatmul.mubr.f32.vlgmr.msra.gmra.mxu1 %v681_v1  ;;  %v1602_v1 = vand.u32 4294901760, %v1601_v62 }
 0x184   :  { %6475 = vmatprep.mubr.msk.f32.mxu1 %vm7010_vm1, %v7009_v55 }
 0x185   :  { %v1603_v2 = vsub.f32 %v1601_v62, %v1602_v1 }
 0x187   :  { %v1604_v3 = vand.u32 4294901760, %v1603_v2 }
 0x233   :  { %v687_v13 = vpop.f32.mrf.mxu0 }
 0x235   :  { %v6442_v14 = vpop.f32.mrf.mxu0 }
 0x237   :  { %v837_v15 = vpop.f32.mrf.mxu0 }
 0x239   :  { %v6452_v16 = vpop.f32.mrf.mxu0 }
 0x23b   :  { %v763_v17 = vpop.f32.mrf.mxu1  ;;  %v985_v18 = vpop.f32.mrf.mxu0 }
 0x23c   :  { %v764_v19 = vadd.f32 %v763_v17, %v687_v13 }
 0x23d   :  { %v6447_v20 = vpop.f32.mrf.mxu1  ;;  %v6462_v21 = vpop.f32.mrf.mxu0 }
 0x23e   :  { %v838_v22 = vadd.f32 %v837_v15, %v764_v19 }
 0x23f   :  { %v911_v23 = vpop.f32.mrf.mxu1 }
 0x240   :  { %v912_v24 = vadd.f32 %v911_v23, %v838_v22 }
 0x241   :  { %v6457_v25 = vpop.f32.mrf.mxu1 }
 0x242   :  { %v986_v26 = vadd.f32 %v985_v18, %v912_v24 }
 0x243   :  { %v1057_v27 = vpop.f32.mrf.mxu1 }
 0x244   :  { %v1058_v28 = vadd.f32 %v1057_v27, %v986_v26 }
 0x245   :  { %v6467_v29 = vpop.f32.mrf.mxu1 }
 0x246   :  { %v1061_v30 = vmul.f32 0.25, %v1058_v28 }
 0x248   :  { %v1063_v31 = vsel %vm1062_vm3, %v1061_v30, -inf }
 0x249   :  { %1064 = vmax.xlane.f32.xlu0 %v1063_v31 }
 0x2d2   :  { %v1065_v32 = vpop.xlane.xlu0 %1064 }
 0x2d3   :  { %v1066_v33 = vsub.f32 %v1061_v30, %v1065_v32 }
 0x2d5   :  { %v1067_v34 = vmul.f32 1.442695, %v1066_v33 }
 0x2d7   :  { %6936 = vpow2.f32 %v1067_v34 }
 0x2e4   :  { %v6937_v35 = vpop.eup %6936 }
 0x2e5   :  { %v1069_v36 = vsel %vm1062_vm3, %v6937_v35, 0.0 }
 0x2e6   :  { %1070 = vadd.xlane.f32.xlu1 %v1069_v36 }
 0x2f7   :  { %1074 = vrot.lane.b32.xlu1 %v7167_v63, %s7012_s23 }
 0x2fb   :  { %1528 = vrot.lane.b32.xlu1 %v7165_v61, %s7011_s2 }
 0x36f   :  { %v1071_v37 = vpop.xlane.xlu1 %1070 }
 0x370   :  { %6938 = vrcp.f32 %v1071_v37 }
 0x373   :  { %v1075_v38 = vpop.permute.xlu1 %1074 }
 0x374   :  { %v1111_v39 = vand.u32 4294901760, %v1075_v38 }
 0x376   :  { %v1188_v40 = vsub.f32 %v1075_v38, %v1111_v39  ;;  %6469 = vmatpush3.msra.mxu0 %v1111_v39 }
 0x377   :  { %v1529_v41 = vpop.permute.xlu1 %1528  ;;  %6478 = vmatprep.subr.mxu0 %v7009_v55 }
 0x378   :  { %v1189_v42 = vand.u32 4294901760, %v1188_v40  ;;  %v1532_v43 = vsel %vm610_vm2, %v1529_v41, 0 }
 0x379   :  { %v1565_v45 = vand.u32 4294901760, %v1532_v43 }
 0x37a   :  { %v1190_v44 = vsub.f32 %v1188_v40, %v1189_v42 }
 0x37b   :  { %v1642_v48 = vsub.f32 %v1532_v43, %v1565_v45 }
 0x37c   :  { %v1191_v46 = vand.u32 4294901760, %v1190_v44 }
 0x37d   :  { %v6939_v47 = vpop.eup %6938  ;;  %v1643_v52 = vand.u32 4294901760, %v1642_v48 }
 0x37e   :  { %6474 = vmatpush3.msra.mxu1 %v1191_v46  ;;  %v1073_v49 = vmul.f32 %v6939_v47, %v6937_v35 }
 0x37f   :  { %6483 = vmatprep.subr.mxu1 %v7009_v55  ;;  %v1644_v58 = vsub.f32 %v1642_v48, %v1643_v52 }
 0x380   :  { %v1078_v50 = vsel %vm1062_vm3, %v1073_v49, 0 }
 0x381   :  { %v1146_v51 = vand.u32 4294901760, %v1078_v50  ;;  %v1645_v0 = vand.u32 4294901760, %v1644_v58 }
 0x383   :  { %v1147_v54 = vsub.f32 %v1078_v50, %v1146_v51  ;;  %6476 = vmatmul.mubr.f32.vlgmr.msra.gmra.mxu1 %v1146_v51 }
 0x384   :  { %6484 = vmatpush3.msra.mxu1 %v1111_v39  ;;  %6485 = vmatprep.mubr.msk.f32.mxu1 %vm7010_vm1, %v7009_v55 }
 0x385   :  { %6493 = vmatprep.subr.mxu1 %v7009_v55  ;;  %v1148_v56 = vand.u32 4294901760, %v1147_v54 }
 0x387   :  { %6486 = vmatmul.mubr.f32.vlgmr.msra.gmra.mxu1 %v1148_v56  ;;  %v1149_v59 = vsub.f32 %v1147_v54, %v1148_v56 }
 0x388   :  { %6494 = vmatpush3.msra.mxu1 %v1111_v39  ;;  %6495 = vmatprep.mubr.msk.f32.mxu1 %vm7010_vm1, %v7009_v55 }
 0x389   :  { %6503 = vmatprep.subr.mxu1 %v7009_v55  ;;  %v1150_v60 = vand.u32 4294901760, %v1149_v59 }
 0x38b   :  { %6471 = vmatmul.mubr.f32.vlgmr.msra.gmra.mxu0 %v1150_v60  ;;  %6496 = vmatmul.mubr.f32.vlgmr.msra.gmra.mxu1 %v1146_v51 }
 0x38c   :  { %6479 = vmatpush3.msra.mxu0 %v1188_v40  ;;  %6504 = vmatpush3.xpose.msra.mxu1 %v1645_v0 }
 0x38d   :  { %6480 = vmatprep.mubr.msk.f32.mxu0 %vm7010_vm1, %v7009_v55  ;;  %6488 = vmatprep.subr.mxu0 %v7009_v55 }
 0x38e   :  { %6505 = vmatprep.mubr.msk.f32.mxu1 %vm7010_vm1, %v7009_v55  ;;  %6513 = vmatprep.subr.mxu1 %v7009_v55 }
 0x38f   :  { %6481 = vmatmul.mubr.f32.vlgmr.msra.gmra.mxu0 %v1147_v54  ;;  %6506 = vmatmul.mubr.f32.vlgmr.msra.gmra.mxu1 %v1600_v57 }
 0x390   :  { %6489 = vmatpush3.msra.mxu0 %v1189_v42  ;;  %6514 = vmatpush3.xpose.msra.mxu1 %v1565_v45 }
 0x391   :  { %6490 = vmatprep.mubr.msk.f32.mxu0 %vm7010_vm1, %v7009_v55  ;;  %6498 = vmatprep.subr.mxu0 %v7009_v55 }
 0x392   :  { %6515 = vmatprep.mubr.msk.f32.mxu1 %vm7010_vm1, %v7009_v55  ;;  %6523 = vmatprep.subr.mxu1 %v7009_v55 }
 0x393   :  { %6491 = vmatmul.mubr.f32.vlgmr.msra.gmra.mxu0 %v1146_v51  ;;  %6516 = vmatmul.mubr.f32.vlgmr.msra.gmra.mxu1 %v1602_v1 }
 0x394   :  { %6499 = vmatpush3.xpose.msra.mxu0 %v1565_v45  ;;  %6524 = vmatpush3.xpose.msra.mxu1 %v1565_v45 }
 0x395   :  { %6500 = vmatprep.mubr.msk.f32.mxu0 %vm7010_vm1, %v7009_v55  ;;  %6508 = vmatprep.subr.mxu0 %v7009_v55 }
 0x396   :  { %6525 = vmatprep.mubr.msk.f32.mxu1 %vm7010_vm1, %v7009_v55  ;;  %6533 = vmatprep.subr.mxu1 %v7009_v55 }
 0x397   :  { %6501 = vmatmul.mubr.f32.vlgmr.msra.gmra.mxu0 %v1604_v3  ;;  %6526 = vmatmul.mubr.f32.vlgmr.msra.gmra.mxu1 %v1600_v57 }
 0x398   :  { %6509 = vmatpush3.xpose.msra.mxu0 %v1642_v48  ;;  %6510 = vmatprep.mubr.msk.f32.mxu0 %vm7010_vm1, %v7009_v55 }
 0x399   :  { %6518 = vmatprep.subr.mxu0 %v7009_v55  ;;  %6535 = vmatprep.mubr.msk.f32.mxu1 %vm7010_vm1, %v7009_v55 }
 0x39b   :  { %6511 = vmatmul.mubr.f32.vlgmr.msra.gmra.mxu0 %v1601_v62 }
 0x39c   :  { %6519 = vmatpush3.xpose.msra.mxu0 %v1643_v52  ;;  %6520 = vmatprep.mubr.msk.f32.mxu0 %vm7010_vm1, %v7009_v55 }
 0x39d   :  { %6528 = vmatprep.subr.mxu0 %v7009_v55 }
 0x39f   :  { %6521 = vmatmul.mubr.f32.vlgmr.msra.gmra.mxu0 %v1600_v57 }
 0x3a0   :  { %6530 = vmatprep.mubr.msk.f32.mxu0 %vm7010_vm1, %v7009_v55 }
 0x443   :  { %v1228_v4 = vpop.f32.mrf.mxu1 }
 0x445   :  { %v6477_v5 = vpop.f32.mrf.mxu1 }
 0x447   :  { %v1376_v6 = vpop.f32.mrf.mxu1 }
 0x449   :  { %v6487_v7 = vpop.f32.mrf.mxu1 }
 0x44b   :  { %v1152_v8 = vpop.f32.mrf.mxu0  ;;  %v1522_v9 = vpop.f32.mrf.mxu1 }
 0x44c   :  { %v1229_v12 = vadd.f32 %v1228_v4, %v1152_v8 }
 0x44d   :  { %v6472_v10 = vpop.f32.mrf.mxu0  ;;  %v6497_v11 = vpop.f32.mrf.mxu1 }
 0x44f   :  { %v1302_v13 = vpop.f32.mrf.mxu0  ;;  %v1682_v14 = vpop.f32.mrf.mxu1 }
 0x450   :  { %v1303_v15 = vadd.f32 %v1302_v13, %v1229_v12 }
 0x451   :  { %v6482_v16 = vpop.f32.mrf.mxu0  ;;  %v6507_v17 = vpop.f32.mrf.mxu1 }
 0x452   :  { %v1377_v18 = vadd.f32 %v1376_v6, %v1303_v15 }
 0x453   :  { %v1450_v19 = vpop.f32.mrf.mxu0  ;;  %v1830_v20 = vpop.f32.mrf.mxu1 }
 0x454   :  { %v1451_v21 = vadd.f32 %v1450_v19, %v1377_v18 }
 0x455   :  { %v6492_v22 = vpop.f32.mrf.mxu0  ;;  %v6517_v23 = vpop.f32.mrf.mxu1 }
 0x456   :  { %v1523_v24 = vadd.f32 %v1522_v9, %v1451_v21 }
 0x457   :  { %v1606_v25 = vpop.f32.mrf.mxu0  ;;  %v1976_v26 = vpop.f32.mrf.mxu1 }
 0x458   :  { %1526 = vst.msk [vmem:[#allocation2] sm:$0xff] %vm610_vm2, %v1523_v24  ;;  %v1683_v29 = vadd.f32 %v1682_v14, %v1606_v25 }
 0x459   :  { %v6502_v27 = vpop.f32.mrf.mxu0  ;;  %v6527_v28 = vpop.f32.mrf.mxu1 }
 0x45b   :  { %v1756_v30 = vpop.f32.mrf.mxu0 }
 0x45c   :  { %v1757_v31 = vadd.f32 %v1756_v30, %v1683_v29 }
 0x45d   :  { %v6512_v32 = vpop.f32.mrf.mxu0 }
 0x45e   :  { %v1831_v33 = vadd.f32 %v1830_v20, %v1757_v31 }
 0x45f   :  { %v1904_v34 = vpop.f32.mrf.mxu0 }
 0x460   :  { %v1905_v35 = vadd.f32 %v1904_v34, %v1831_v33 }
 0x461   :  { %v6522_v36 = vpop.f32.mrf.mxu0 }
 0x462   :  { %v1977_v37 = vadd.f32 %v1976_v26, %v1905_v35 }
 0x464   :  { %v1980_v38 = vmul.f32 0.25, %v1977_v37 }
 0x466   :  { %v1981_v39 = vsel %vm1062_vm3, %v1980_v38, -inf }
 0x467   :  { %1982 = vmax.xlane.f32.xlu1 %v1981_v39 }
 0x478   :  { %2445 = vrot.lane.b32.xlu1 %v7167_v63, %s7013_s24 }
 0x4f0   :  { %v1983_v40 = vpop.xlane.xlu1 %1982 }
 0x4f1   :  { %v1984_v41 = vsub.f32 %v1980_v38, %v1983_v40 }
 0x4f3   :  { %v1985_v42 = vmul.f32 1.442695, %v1984_v41 }
 0x4f4   :  { %v2446_v59 = vpop.permute.xlu1 %2445 }
 0x4f5   :  { %6940 = vpow2.f32 %v1985_v42  ;;  %v2449_v0 = vsel %vm610_vm2, %v2446_v59, 0 }
 0x4f6   :  { %v2519_v3 = vand.u32 4294901760, %v2449_v0 }
 0x4f8   :  { %v2520_v7 = vsub.f32 %v2449_v0, %v2519_v3 }
 0x4fa   :  { %v2521_v10 = vand.u32 4294901760, %v2520_v7 }
 0x4fc   :  { %v2522_v11 = vsub.f32 %v2520_v7, %v2521_v10 }
 0x4fe   :  { %v2523_v12 = vand.u32 4294901760, %v2522_v11 }
 0x502   :  { %v6941_v43 = vpop.eup %6940 }
 0x503   :  { %v1987_v44 = vsel %vm1062_vm3, %v6941_v43, 0.0 }
 0x504   :  { %1988 = vadd.xlane.f32.xlu0 %v1987_v44 }
 0x51a   :  { %1992 = vrot.lane.b32.xlu0 %v7165_v61, %s7012_s23 }
 0x51e   :  { %2447 = vrot.lane.b32.xlu0 %v7167_v63, %s7014_s25 }
 0x58d   :  { %v1989_v45 = vpop.xlane.xlu0 %1988 }
 0x58e   :  { %6942 = vrcp.f32 %v1989_v45 }
 0x591   :  { %v1993_v46 = vpop.permute.xlu0 %1992 }
 0x592   :  { %v2029_v47 = vand.u32 4294901760, %v1993_v46 }
 0x594   :  { %v2106_v48 = vsub.f32 %v1993_v46, %v2029_v47  ;;  %6529 = vmatpush3.msra.mxu0 %v2029_v47 }
 0x595   :  { %v2448_v49 = vpop.permute.xlu0 %2447  ;;  %6538 = vmatprep.subr.mxu0 %v7009_v55 }
 0x596   :  { %v2107_v50 = vand.u32 4294901760, %v2106_v48  ;;  %v2451_v51 = vsel %vm610_vm2, %v2448_v49, 0 }
 0x597   :  { %v2484_v53 = vand.u32 4294901760, %v2451_v51 }
 0x598   :  { %v2108_v52 = vsub.f32 %v2106_v48, %v2107_v50 }
 0x599   :  { %v2561_v57 = vsub.f32 %v2451_v51, %v2484_v53 }
 0x59a   :  { %v2109_v54 = vand.u32 4294901760, %v2108_v52 }
 0x59b   :  { %v6943_v56 = vpop.eup %6942  ;;  %v2562_v1 = vand.u32 4294901760, %v2561_v57 }
 0x59c   :  { %6534 = vmatpush3.msra.mxu1 %v2109_v54  ;;  %v1991_v58 = vmul.f32 %v6943_v56, %v6941_v43 }
 0x59d   :  { %6543 = vmatprep.subr.mxu1 %v7009_v55  ;;  %v2563_v5 = vsub.f32 %v2561_v57, %v2562_v1 }
 0x59e   :  { %v1996_v60 = vsel %vm1062_vm3, %v1991_v58, 0 }
 0x59f   :  { %v2064_v62 = vand.u32 4294901760, %v1996_v60  ;;  %v2564_v9 = vand.u32 4294901760, %v2563_v5 }
 0x5a1   :  { %v2065_v2 = vsub.f32 %v1996_v60, %v2064_v62  ;;  %6536 = vmatmul.mubr.f32.vlgmr.msra.gmra.mxu1 %v2064_v62 }
 0x5a2   :  { %6544 = vmatpush3.msra.mxu1 %v2029_v47  ;;  %6545 = vmatprep.mubr.msk.f32.mxu1 %vm7010_vm1, %v7009_v55 }
 0x5a3   :  { %6553 = vmatprep.subr.mxu1 %v7009_v55  ;;  %v2066_v4 = vand.u32 4294901760, %v2065_v2 }
 0x5a5   :  { %6546 = vmatmul.mubr.f32.vlgmr.msra.gmra.mxu1 %v2066_v4  ;;  %v2067_v6 = vsub.f32 %v2065_v2, %v2066_v4 }
 0x5a6   :  { %6554 = vmatpush3.msra.mxu1 %v2029_v47  ;;  %6555 = vmatprep.mubr.msk.f32.mxu1 %vm7010_vm1, %v7009_v55 }
 0x5a7   :  { %6563 = vmatprep.subr.mxu1 %v7009_v55  ;;  %v2068_v8 = vand.u32 4294901760, %v2067_v6 }
 0x5a9   :  { %6531 = vmatmul.mubr.f32.vlgmr.msra.gmra.mxu0 %v2068_v8  ;;  %6556 = vmatmul.mubr.f32.vlgmr.msra.gmra.mxu1 %v2064_v62 }
 0x5aa   :  { %6539 = vmatpush3.msra.mxu0 %v2106_v48  ;;  %6564 = vmatpush3.xpose.msra.mxu1 %v2564_v9 }
 0x5ab   :  { %6540 = vmatprep.mubr.msk.f32.mxu0 %vm7010_vm1, %v7009_v55  ;;  %6548 = vmatprep.subr.mxu0 %v7009_v55 }
 0x5ac   :  { %6565 = vmatprep.mubr.msk.f32.mxu1 %vm7010_vm1, %v7009_v55  ;;  %6573 = vmatprep.subr.mxu1 %v7009_v55 }
 0x5ad   :  { %6541 = vmatmul.mubr.f32.vlgmr.msra.gmra.mxu0 %v2065_v2  ;;  %6566 = vmatmul.mubr.f32.vlgmr.msra.gmra.mxu1 %v2519_v3 }
 0x5ae   :  { %6549 = vmatpush3.msra.mxu0 %v2107_v50  ;;  %6574 = vmatpush3.xpose.msra.mxu1 %v2484_v53 }
 0x5af   :  { %6550 = vmatprep.mubr.msk.f32.mxu0 %vm7010_vm1, %v7009_v55  ;;  %6558 = vmatprep.subr.mxu0 %v7009_v55 }
 0x5b0   :  { %6575 = vmatprep.mubr.msk.f32.mxu1 %vm7010_vm1, %v7009_v55  ;;  %6583 = vmatprep.subr.mxu1 %v7009_v55 }
 0x5b1   :  { %6551 = vmatmul.mubr.f32.vlgmr.msra.gmra.mxu0 %v2064_v62  ;;  %6576 = vmatmul.mubr.f32.vlgmr.msra.gmra.mxu1 %v2521_v10 }
 0x5b2   :  { %6559 = vmatpush3.xpose.msra.mxu0 %v2484_v53  ;;  %6584 = vmatpush3.xpose.msra.mxu1 %v2484_v53 }
 0x5b3   :  { %6560 = vmatprep.mubr.msk.f32.mxu0 %vm7010_vm1, %v7009_v55  ;;  %6568 = vmatprep.subr.mxu0 %v7009_v55 }
 0x5b4   :  { %6585 = vmatprep.mubr.msk.f32.mxu1 %vm7010_vm1, %v7009_v55  ;;  %6593 = vmatprep.subr.mxu1 %v7009_v55 }
 0x5b5   :  { %6561 = vmatmul.mubr.f32.vlgmr.msra.gmra.mxu0 %v2523_v12  ;;  %6586 = vmatmul.mubr.f32.vlgmr.msra.gmra.mxu1 %v2519_v3 }
 0x5b6   :  { %6569 = vmatpush3.xpose.msra.mxu0 %v2561_v57  ;;  %6570 = vmatprep.mubr.msk.f32.mxu0 %vm7010_vm1, %v7009_v55 }
 0x5b7   :  { %6578 = vmatprep.subr.mxu0 %v7009_v55  ;;  %6595 = vmatprep.mubr.msk.f32.mxu1 %vm7010_vm1, %v7009_v55 }
 0x5b9   :  { %6571 = vmatmul.mubr.f32.vlgmr.msra.gmra.mxu0 %v2520_v7 }
 0x5ba   :  { %6579 = vmatpush3.xpose.msra.mxu0 %v2562_v1  ;;  %6580 = vmatprep.mubr.msk.f32.mxu0 %vm7010_vm1, %v7009_v55 }
 0x5bb   :  { %6588 = vmatprep.subr.mxu0 %v7009_v55 }
 0x5bd   :  { %6581 = vmatmul.mubr.f32.vlgmr.msra.gmra.mxu0 %v2519_v3 }
 0x5be   :  { %6590 = vmatprep.mubr.msk.f32.mxu0 %vm7010_vm1, %v7009_v55 }
 0x661   :  { %v2146_v13 = vpop.f32.mrf.mxu1 }
 0x663   :  { %v6537_v14 = vpop.f32.mrf.mxu1 }
 0x665   :  { %v2294_v15 = vpop.f32.mrf.mxu1 }
 0x667   :  { %v6547_v16 = vpop.f32.mrf.mxu1 }
 0x669   :  { %v2070_v17 = vpop.f32.mrf.mxu0  ;;  %v2440_v18 = vpop.f32.mrf.mxu1 }
 0x66a   :  { %v2147_v21 = vadd.f32 %v2146_v13, %v2070_v17 }
 0x66b   :  { %v6532_v19 = vpop.f32.mrf.mxu0  ;;  %v6557_v20 = vpop.f32.mrf.mxu1 }
 0x66d   :  { %v2220_v22 = vpop.f32.mrf.mxu0  ;;  %v2601_v23 = vpop.f32.mrf.mxu1 }
 0x66e   :  { %v2221_v24 = vadd.f32 %v2220_v22, %v2147_v21 }
 0x66f   :  { %v6542_v25 = vpop.f32.mrf.mxu0  ;;  %v6567_v26 = vpop.f32.mrf.mxu1 }
 0x670   :  { %v2295_v27 = vadd.f32 %v2294_v15, %v2221_v24 }
 0x671   :  { %v2368_v28 = vpop.f32.mrf.mxu0  ;;  %v2749_v29 = vpop.f32.mrf.mxu1 }
 0x672   :  { %v2369_v30 = vadd.f32 %v2368_v28, %v2295_v27 }
 0x673   :  { %v6552_v31 = vpop.f32.mrf.mxu0  ;;  %v6577_v32 = vpop.f32.mrf.mxu1 }
 0x674   :  { %v2441_v33 = vadd.f32 %v2440_v18, %v2369_v30 }
 0x675   :  { %v2525_v34 = vpop.f32.mrf.mxu0  ;;  %v2895_v35 = vpop.f32.mrf.mxu1 }
 0x676   :  { %2444 = vst.msk [vmem:[#allocation2 + $0x8] sm:$0xff] %vm610_vm2, %v2441_v33  ;;  %v2602_v38 = vadd.f32 %v2601_v23, %v2525_v34 }
 0x677   :  { %v6562_v36 = vpop.f32.mrf.mxu0  ;;  %v6587_v37 = vpop.f32.mrf.mxu1 }
 0x679   :  { %v2675_v39 = vpop.f32.mrf.mxu0 }
 0x67a   :  { %v2676_v40 = vadd.f32 %v2675_v39, %v2602_v38 }
 0x67b   :  { %v6572_v41 = vpop.f32.mrf.mxu0 }
 0x67c   :  { %v2750_v42 = vadd.f32 %v2749_v29, %v2676_v40 }
 0x67d   :  { %v2823_v43 = vpop.f32.mrf.mxu0 }
 0x67e   :  { %v2824_v44 = vadd.f32 %v2823_v43, %v2750_v42 }
 0x67f   :  { %v6582_v45 = vpop.f32.mrf.mxu0 }
 0x680   :  { %v2896_v46 = vadd.f32 %v2895_v35, %v2824_v44 }
 0x682   :  { %v2899_v47 = vmul.f32 0.25, %v2896_v46 }
 0x684   :  { %v2900_v48 = vsel %vm1062_vm3, %v2899_v47, -inf }
 0x685   :  { %2901 = vmax.xlane.f32.xlu0 %v2900_v48 }
 0x69b   :  { %2911 = vrot.lane.b32.xlu0 %v7167_v63, %s7015_s26 }
 0x69f   :  { %3369 = vrot.lane.b32.xlu0 %v7165_v61, %s7013_s24 }
 0x70e   :  { %v2902_v49 = vpop.xlane.xlu0 %2901 }
 0x70f   :  { %v2903_v50 = vsub.f32 %v2899_v47, %v2902_v49 }
 0x711   :  { %v2904_v51 = vmul.f32 1.442695, %v2903_v50 }
 0x712   :  { %v2912_v52 = vpop.permute.xlu0 %2911 }
 0x713   :  { %6944 = vpow2.f32 %v2904_v51  ;;  %v2948_v53 = vand.u32 4294901760, %v2912_v52 }
 0x715   :  { %v3025_v54 = vsub.f32 %v2912_v52, %v2948_v53  ;;  %6589 = vmatpush3.msra.mxu0 %v2948_v53 }
 0x716   :  { %6598 = vmatprep.subr.mxu0 %v7009_v55  ;;  %v3370_v5 = vpop.permute.xlu0 %3369 }
 0x717   :  { %v3026_v56 = vand.u32 4294901760, %v3025_v54  ;;  %v3373_v8 = vsel %vm610_vm2, %v3370_v5, 0 }
 0x718   :  { %v3443_v11 = vand.u32 4294901760, %v3373_v8 }
 0x719   :  { %v3027_v57 = vsub.f32 %v3025_v54, %v3026_v56 }
 0x71a   :  { %v3444_v15 = vsub.f32 %v3373_v8, %v3443_v11 }
 0x71b   :  { %v3028_v58 = vand.u32 4294901760, %v3027_v57 }
 0x71c   :  { %v3445_v18 = vand.u32 4294901760, %v3444_v15 }
 0x71d   :  { %6594 = vmatpush3.msra.mxu1 %v3028_v58 }
 0x71e   :  { %6603 = vmatprep.subr.mxu1 %v7009_v55  ;;  %v3446_v19 = vsub.f32 %v3444_v15, %v3445_v18 }
 0x720   :  { %v6945_v63 = vpop.eup %6944  ;;  %v3447_v20 = vand.u32 4294901760, %v3446_v19 }
 0x721   :  { %v2906_v59 = vsel %vm1062_vm3, %v6945_v63, 0.0 }
 0x722   :  { %2907 = vadd.xlane.f32.xlu1 %v2906_v59 }
 0x733   :  { %3371 = vrot.lane.b32.xlu1 %v7165_v61, %s7014_s25 }
 0x7ab   :  { %v2908_v60 = vpop.xlane.xlu1 %2907 }
 0x7ac   :  { %6946 = vrcp.f32 %v2908_v60 }
 0x7af   :  { %v3372_v62 = vpop.permute.xlu1 %3371 }
 0x7b0   :  { %v3375_v0 = vsel %vm610_vm2, %v3372_v62, 0 }
 0x7b1   :  { %v3408_v1 = vand.u32 4294901760, %v3375_v0 }
 0x7b3   :  { %v3485_v3 = vsub.f32 %v3375_v0, %v3408_v1 }
 0x7b5   :  { %v3486_v9 = vand.u32 4294901760, %v3485_v3 }
 0x7b7   :  { %v3487_v13 = vsub.f32 %v3485_v3, %v3486_v9 }
 0x7b9   :  { %v6947_v2 = vpop.eup %6946  ;;  %v3488_v17 = vand.u32 4294901760, %v3487_v13 }
 0x7ba   :  { %v2910_v4 = vmul.f32 %v6947_v2, %v6945_v63 }
 0x7bc   :  { %v2915_v6 = vsel %vm1062_vm3, %v2910_v4, 0 }
 0x7bd   :  { %v2983_v7 = vand.u32 4294901760, %v2915_v6 }
 0x7bf   :  { %v2984_v10 = vsub.f32 %v2915_v6, %v2983_v7  ;;  %6596 = vmatmul.mubr.f32.vlgmr.msra.gmra.mxu1 %v2983_v7 }
 0x7c0   :  { %6604 = vmatpush3.msra.mxu1 %v2948_v53  ;;  %6605 = vmatprep.mubr.msk.f32.mxu1 %vm7010_vm1, %v7009_v55 }
 0x7c1   :  { %6613 = vmatprep.subr.mxu1 %v7009_v55  ;;  %v2985_v12 = vand.u32 4294901760, %v2984_v10 }
 0x7c3   :  { %6606 = vmatmul.mubr.f32.vlgmr.msra.gmra.mxu1 %v2985_v12  ;;  %v2986_v14 = vsub.f32 %v2984_v10, %v2985_v12 }
 0x7c4   :  { %6614 = vmatpush3.msra.mxu1 %v2948_v53  ;;  %6615 = vmatprep.mubr.msk.f32.mxu1 %vm7010_vm1, %v7009_v55 }
 0x7c5   :  { %6623 = vmatprep.subr.mxu1 %v7009_v55  ;;  %v2987_v16 = vand.u32 4294901760, %v2986_v14 }
 0x7c7   :  { %6591 = vmatmul.mubr.f32.vlgmr.msra.gmra.mxu0 %v2987_v16  ;;  %6616 = vmatmul.mubr.f32.vlgmr.msra.gmra.mxu1 %v2983_v7 }
 0x7c8   :  { %6599 = vmatpush3.msra.mxu0 %v3025_v54  ;;  %6624 = vmatpush3.xpose.msra.mxu1 %v3488_v17 }
 0x7c9   :  { %6600 = vmatprep.mubr.msk.f32.mxu0 %vm7010_vm1, %v7009_v55  ;;  %6608 = vmatprep.subr.mxu0 %v7009_v55 }
 0x7ca   :  { %6625 = vmatprep.mubr.msk.f32.mxu1 %vm7010_vm1, %v7009_v55  ;;  %6633 = vmatprep.subr.mxu1 %v7009_v55 }
 0x7cb   :  { %6601 = vmatmul.mubr.f32.vlgmr.msra.gmra.mxu0 %v2984_v10  ;;  %6626 = vmatmul.mubr.f32.vlgmr.msra.gmra.mxu1 %v3443_v11 }
 0x7cc   :  { %6609 = vmatpush3.msra.mxu0 %v3026_v56  ;;  %6634 = vmatpush3.xpose.msra.mxu1 %v3408_v1 }
 0x7cd   :  { %6610 = vmatprep.mubr.msk.f32.mxu0 %vm7010_vm1, %v7009_v55  ;;  %6618 = vmatprep.subr.mxu0 %v7009_v55 }
 0x7ce   :  { %6635 = vmatprep.mubr.msk.f32.mxu1 %vm7010_vm1, %v7009_v55  ;;  %6643 = vmatprep.subr.mxu1 %v7009_v55 }
 0x7cf   :  { %6611 = vmatmul.mubr.f32.vlgmr.msra.gmra.mxu0 %v2983_v7  ;;  %6636 = vmatmul.mubr.f32.vlgmr.msra.gmra.mxu1 %v3445_v18 }
 0x7d0   :  { %6619 = vmatpush3.xpose.msra.mxu0 %v3408_v1  ;;  %6644 = vmatpush3.xpose.msra.mxu1 %v3408_v1 }
 0x7d1   :  { %6620 = vmatprep.mubr.msk.f32.mxu0 %vm7010_vm1, %v7009_v55  ;;  %6628 = vmatprep.subr.mxu0 %v7009_v55 }
 0x7d2   :  { %6645 = vmatprep.mubr.msk.f32.mxu1 %vm7010_vm1, %v7009_v55  ;;  %6653 = vmatprep.subr.mxu1 %v7009_v55 }
 0x7d3   :  { %6621 = vmatmul.mubr.f32.vlgmr.msra.gmra.mxu0 %v3447_v20  ;;  %6646 = vmatmul.mubr.f32.vlgmr.msra.gmra.mxu1 %v3443_v11 }
 0x7d4   :  { %6629 = vmatpush3.xpose.msra.mxu0 %v3485_v3  ;;  %6630 = vmatprep.mubr.msk.f32.mxu0 %vm7010_vm1, %v7009_v55 }
 0x7d5   :  { %6638 = vmatprep.subr.mxu0 %v7009_v55  ;;  %6655 = vmatprep.mubr.msk.f32.mxu1 %vm7010_vm1, %v7009_v55 }
 0x7d7   :  { %6631 = vmatmul.mubr.f32.vlgmr.msra.gmra.mxu0 %v3444_v15 }
 0x7d8   :  { %6639 = vmatpush3.xpose.msra.mxu0 %v3486_v9  ;;  %6640 = vmatprep.mubr.msk.f32.mxu0 %vm7010_vm1, %v7009_v55 }
 0x7d9   :  { %6648 = vmatprep.subr.mxu0 %v7009_v55 }
 0x7db   :  { %6641 = vmatmul.mubr.f32.vlgmr.msra.gmra.mxu0 %v3443_v11 }
 0x7dc   :  { %6650 = vmatprep.mubr.msk.f32.mxu0 %vm7010_vm1, %v7009_v55 }
 0x87f   :  { %v3065_v21 = vpop.f32.mrf.mxu1 }
 0x881   :  { %v6597_v22 = vpop.f32.mrf.mxu1 }
 0x883   :  { %v3213_v23 = vpop.f32.mrf.mxu1 }
 0x885   :  { %v6607_v24 = vpop.f32.mrf.mxu1 }
 0x887   :  { %v2989_v25 = vpop.f32.mrf.mxu0  ;;  %v3359_v26 = vpop.f32.mrf.mxu1 }
 0x888   :  { %v3066_v27 = vadd.f32 %v3065_v21, %v2989_v25 }
 0x889   :  { %v6592_v28 = vpop.f32.mrf.mxu0  ;;  %v6617_v29 = vpop.f32.mrf.mxu1 }
 0x88a   :  { %v4295_v29 = vld [vmem:[%s7795_s3 + $0x8] sm:$0xff] }
 0x88b   :  { %v3139_v30 = vpop.f32.mrf.mxu0  ;;  %v3525_v31 = vpop.f32.mrf.mxu1 }
 0x88c   :  { %v3140_v32 = vadd.f32 %v3139_v30, %v3066_v27 }
 0x88d   :  { %v6602_v33 = vpop.f32.mrf.mxu0  ;;  %v6627_v34 = vpop.f32.mrf.mxu1 }
 0x88e   :  { %v3214_v35 = vadd.f32 %v3213_v23, %v3140_v32  ;;  %v4297_v23 = vld [vmem:[%s7795_s3 + $0x18] sm:$0xff]  ;;  %v7388_v32 = vand.u32 4294901760, %v4295_v29  ;;  %v4294_v34 = vld [vmem:[%s7795_s3] sm:$0xff] }
 0x88f   :  { %v3287_v36 = vpop.f32.mrf.mxu0  ;;  %v3673_v37 = vpop.f32.mrf.mxu1  ;;  %v7367_v24 = vand.u32 4294901760, %v4297_v23 }
 0x890   :  { %v3288_v38 = vadd.f32 %v3287_v36, %v3214_v35 }
 0x891   :  { %v6612_v39 = vpop.f32.mrf.mxu0  ;;  %v6637_v40 = vpop.f32.mrf.mxu1  ;;  %v7373_v27 = vsub.f32 %v4297_v23, %v7367_v24 }
 0x892   :  { %v3360_v41 = vadd.f32 %v3359_v26, %v3288_v38  ;;  %v4296_v26 = vld [vmem:[%s7795_s3 + $0x10] sm:$0xff]  ;;  %v7403_v38 = vand.u32 4294901760, %v4294_v34 }
 0x893   :  { %v3449_v42 = vpop.f32.mrf.mxu0  ;;  %v3819_v43 = vpop.f32.mrf.mxu1  ;;  %v7375_v28 = vand.u32 4294901760, %v4296_v26  ;;  %v7383_v30 = vand.u32 4294901760, %v7373_v27 }
 0x894   :  { %v3526_v46 = vadd.f32 %v3525_v31, %v3449_v42 }
 0x895   :  { %v6622_v44 = vpop.f32.mrf.mxu0  ;;  %v6647_v45 = vpop.f32.mrf.mxu1  ;;  %v7386_v31 = vsub.f32 %v4296_v26, %v7375_v28  ;;  %v4428_v35 = vsub.f32 %v7373_v27, %v7383_v30 }
 0x897   :  { %v3599_v47 = vpop.f32.mrf.mxu0  ;;  %v7398_v36 = vand.u32 4294901760, %v7386_v31 }
 0x898   :  { %v3600_v48 = vadd.f32 %v3599_v47, %v3526_v46  ;;  %v4447_v46 = vsub.f32 %v4294_v34, %v7403_v38  ;;  %v6961_v34 = vld [vmem:[#allocation3] sm:$0xff] }
 0x899   :  { %v6632_v49 = vpop.f32.mrf.mxu0  ;;  %v4435_v42 = vsub.f32 %v7386_v31, %v7398_v36 }
 0x89a   :  { %v3674_v50 = vadd.f32 %v3673_v37, %v3600_v48  ;;  %v7401_v37 = vsub.f32 %v4295_v29, %v7388_v32 }
 0x89b   :  { %v3747_v51 = vpop.f32.mrf.mxu0  ;;  %v4436_v48 = vand.u32 4294901760, %v4435_v42 }
 0x89c   :  { %v3748_v52 = vadd.f32 %v3747_v51, %v3674_v50  ;;  %v7418_v51 = vand.u32 4294901760, %v4447_v46 }
 0x89d   :  { %v6642_v53 = vpop.f32.mrf.mxu0 }
 0x89e   :  { %v3820_v54 = vadd.f32 %v3819_v43, %v3748_v52  ;;  %v7410_v43 = vand.u32 4294901760, %v7401_v37 }
 0x8a0   :  { %v3823_v56 = vmul.f32 0.25, %v3820_v54  ;;  %v4442_v49 = vsub.f32 %v7401_v37, %v7410_v43 }
 0x8a2   :  { %v3824_v57 = vsel %vm1062_vm3, %v3823_v56, -inf  ;;  %v4443_v53 = vand.u32 4294901760, %v4442_v49  ;;  %v4887_v49 = vld [vmem:[%s7799_s7 + $0x8] sm:$0xff] }
 0x8a3   :  { %3825 = vmax.xlane.f32.xlu0 %v3824_v57 }
 0x8b9   :  { %3835 = vrot.lane.b32.xlu0 %v7165_v61, %s7015_s26 }
 0x92c   :  { %v3826_v58 = vpop.xlane.xlu0 %3825 }
 0x92d   :  { %v3827_v63 = vsub.f32 %v3823_v56, %v3826_v58  ;;  %v4449_v56 = vsub.f32 %v4447_v46, %v7418_v51 }
 0x92f   :  { %v3828_v59 = vmul.f32 1.442695, %v3827_v63  ;;  %v4450_v63 = vand.u32 4294901760, %v4449_v56 }
 0x930   :  { %v3836_v60 = vpop.permute.xlu0 %3835 }
 0x931   :  { %6948 = vpow2.f32 %v3828_v59  ;;  %v3872_v62 = vand.u32 4294901760, %v3836_v60 }
 0x933   :  { %v3949_v0 = vsub.f32 %v3836_v60, %v3872_v62  ;;  %6649 = vmatpush3.msra.mxu0 %v3872_v62 }
 0x934   :  { %6658 = vmatprep.subr.mxu0 %v7009_v55 }
 0x935   :  { %v3950_v1 = vand.u32 4294901760, %v3949_v0 }
 0x937   :  { %v3951_v2 = vsub.f32 %v3949_v0, %v3950_v1 }
 0x939   :  { %v3952_v3 = vand.u32 4294901760, %v3951_v2 }
 0x93b   :  { %6654 = vmatpush3.msra.mxu1 %v3952_v3 }
 0x93c   :  { %6663 = vmatprep.subr.mxu1 %v7009_v55 }
 0x93e   :  { %v6949_v4 = vpop.eup %6948 }
 0x93f   :  { %v3830_v5 = vsel %vm1062_vm3, %v6949_v4, 0.0 }
 0x940   :  { %3831 = vadd.xlane.f32.xlu1 %v3830_v5 }
 0x951   :  { %3364 = vrot.lane.b32.xlu1 %v3360_v41, %s7016_s27  ;;  %v4429_v41 = vand.u32 4294901760, %v4428_v35 }
 0x9c9   :  { %v3832_v61 = vpop.xlane.xlu1 %3831 }
 0x9ca   :  { %6950 = vrcp.f32 %v3832_v61 }
 0x9cd   :  { %v3365_v6 = vpop.permute.xlu1 %3364 }
 0x9ce   :  { %3368 = vst.msk [vmem:[#allocation2] sm:$0xff] %vm3367_vm4, %v3365_v6 }
 0x9d5   :  { %v4292_v7 = vld [vmem:[#allocation2] sm:$0xff] }
 0x9d6   :  { %v4306_v10 = vsel %vm72_vm0, %v4292_v7, 0 }
 0x9d7   :  { %v6951_v8 = vpop.eup %6950  ;;  %v7344_v13 = vand.u32 4294901760, %v4306_v10 }
 0x9d8   :  { %v3834_v9 = vmul.f32 %v6951_v8, %v6949_v4  ;;  %v6101_v8 = vld [vmem:[%s7796_s4] ss:$0 sm:$0xff] }
 0x9d9   :  { %v7350_v16 = vsub.f32 %v4306_v10, %v7344_v13 }
 0x9da   :  { %v3839_v11 = vsel %vm1062_vm3, %v3834_v9, 0 }
 0x9db   :  { %v3907_v12 = vand.u32 4294901760, %v3839_v11  ;;  %v4382_v19 = vand.u32 4294901760, %v7350_v16 }
 0x9dd   :  { %v3908_v14 = vsub.f32 %v3839_v11, %v3907_v12  ;;  %6656 = vmatmul.mubr.f32.vlgmr.msra.gmra.mxu1 %v3907_v12  ;;  %v4383_v20 = vsub.f32 %v7350_v16, %v4382_v19 }
 0x9de   :  { %6664 = vmatpush3.msra.mxu1 %v3872_v62  ;;  %6665 = vmatprep.mubr.msk.f32.mxu1 %vm7010_vm1, %v7009_v55 }
 0x9df   :  { %6673 = vmatprep.subr.mxu1 %v7009_v55  ;;  %v3909_v15 = vand.u32 4294901760, %v3908_v14  ;;  %v4384_v21 = vand.u32 4294901760, %v4383_v20 }
 0x9e1   :  { %6666 = vmatmul.mubr.f32.vlgmr.msra.gmra.mxu1 %v3909_v15  ;;  %v3910_v17 = vsub.f32 %v3908_v14, %v3909_v15 }
 0x9e2   :  { %6674 = vmatpush3.msra.mxu1 %v3872_v62  ;;  %6675 = vmatprep.mubr.msk.f32.mxu1 %vm7010_vm1, %v7009_v55 }
 0x9e3   :  { %v3911_v18 = vand.u32 4294901760, %v3910_v17  ;;  %6689 = vmatprep.subr.mxu1 %v4429_v41 }
 0x9e5   :  { %6651 = vmatmul.mubr.f32.vlgmr.msra.gmra.mxu0 %v3911_v18  ;;  %6676 = vmatmul.mubr.f32.vlgmr.msra.gmra.mxu1 %v3907_v12 }
 0x9e6   :  { %6659 = vmatpush3.msra.mxu0 %v3949_v0  ;;  %6697 = vmatprep.mubr.f32.mxu1 %v7344_v13 }
 0x9e7   :  { %6660 = vmatprep.mubr.msk.f32.mxu0 %vm7010_vm1, %v7009_v55  ;;  %6668 = vmatprep.subr.mxu0 %v7009_v55 }
 0x9e8   :  { %6690 = vmatpush3.msra.mxu1 %v4429_v41 }
 0x9e9   :  { %6661 = vmatmul.mubr.f32.vlgmr.msra.gmra.mxu0 %v3908_v14  ;;  %6691 = vmatprep.subr.mxu1 %v4436_v48 }
 0x9ea   :  { %6669 = vmatpush3.msra.mxu0 %v3950_v1  ;;  %6670 = vmatprep.mubr.msk.f32.mxu0 %vm7010_vm1, %v7009_v55 }
 0x9eb   :  { %6678 = vmatprep.subr.mxu0 %v7367_v24  ;;  %6692 = vmatpush3.msra.mxu1 %v4436_v48  ;;  %v4888_v48 = vld [vmem:[%s7799_s7 + $0x10] sm:$0xff] }
 0x9ec   :  { %6693 = vmatprep.subr.mxu1 %v4443_v53 }
 0x9ed   :  { %6671 = vmatmul.mubr.f32.vlgmr.msra.gmra.mxu0 %v3907_v12  ;;  %6694 = vmatpush3.msra.mxu1 %v4443_v53 }
 0x9ee   :  { %6686 = vmatprep.mubr.f32.mxu0 %v4384_v21  ;;  %6679 = vmatpush3.msra.mxu0 %v7367_v24 }
 0x9ef   :  { %6680 = vmatprep.subr.mxu0 %v7375_v28  ;;  %6695 = vmatprep.subr.mxu1 %v4450_v63 }
 0x9f0   :  { %6681 = vmatpush3.msra.mxu0 %v7375_v28  ;;  %6696 = vmatpush3.msra.mxu1 %v4450_v63 }
 0x9f1   :  { %6682 = vmatprep.subr.mxu0 %v7388_v32  ;;  %6711 = vmatprep.subr.mxu1 %v7367_v24 }
 0x9f2   :  { %6683 = vmatpush3.msra.mxu0 %v7388_v32 }
 0x9f3   :  { %6684 = vmatprep.subr.mxu0 %v7403_v38 }
 0x9f4   :  { %6685 = vmatpush3.msra.mxu0 %v7403_v38 }
 0x9f5   :  { %6700 = vmatprep.subr.mxu0 %v7373_v27 }
 0xa9d   :  { %v3989_v22 = vpop.f32.mrf.mxu1 }
 0xa9f   :  { %v6657_v25 = vpop.f32.mrf.mxu1 }
 0xaa1   :  { %v4137_v55 = vpop.f32.mrf.mxu1 }
 0xaa3   :  { %v6667_v33 = vpop.f32.mrf.mxu1 }
 0xaa5   :  { %v3913_v39 = vpop.f32.mrf.mxu0  ;;  %v4283_v40 = vpop.f32.mrf.mxu1 }
 0xaa6   :  { %v3990_v47 = vadd.f32 %v3989_v22, %v3913_v39 }
 0xaa7   :  { %v6652_v44 = vpop.f32.mrf.mxu0  ;;  %v6677_v45 = vpop.f32.mrf.mxu1 }
 0xaa9   :  { %v4063_v50 = vpop.f32.mrf.mxu0 }
 0xaaa   :  { %v4064_v52 = vadd.f32 %v4063_v50, %v3990_v47  ;;  %v4889_v47 = vld [vmem:[%s7799_s7 + $0x18] sm:$0xff] }
 0xaab   :  { %v6662_v54 = vpop.f32.mrf.mxu0  ;;  %v7478_v50 = vand.u32 4294901760, %v4889_v47 }
 0xaac   :  { %v4138_v57 = vadd.f32 %v4137_v55, %v4064_v52  ;;  %v7482_v52 = vand.u32 4294901760, %v4887_v49 }
 0xaad   :  { %v4211_v58 = vpop.f32.mrf.mxu0  ;;  %v7485_v53 = vsub.f32 %v4889_v47, %v7478_v50 }
 0xaae   :  { %v4212_v59 = vadd.f32 %v4211_v58, %v4138_v57  ;;  %v7491_v56 = vsub.f32 %v4887_v49, %v7482_v52  ;;  %v5436_v49 = vld [vmem:[%s7801_s9 + $0x18] sm:$0xff] }
 0xaaf   :  { %v6672_v60 = vpop.f32.mrf.mxu0  ;;  %v7496_v57 = vand.u32 4294901760, %v7485_v53 }
 0xab0   :  { %v4284_v62 = vadd.f32 %v4283_v40, %v4212_v59  ;;  %v7502_v63 = vand.u32 4294901760, %v7491_v56 }
 0xab1   :  { %v5020_v59 = vsub.f32 %v7485_v53, %v7496_v57 }
 0xab2   :  { %4288 = vrot.lane.b32.xlu0 %v4284_v62, %s7016_s27  ;;  %v5034_v62 = vsub.f32 %v7491_v56, %v7502_v63  ;;  %s7017_s27 = smov [#allocation6]  }
 0xab3   :  { %s6088_s30 = sshll.u32 %s7017_s27, 4  ;;  %s6089_s30 = int_to_ptr.vmem [resolvable:$true] %s6088_s30 }
 0xab4   :  { %p6987_p6 = scmp.lt.s32.totalorder %s6089_s30, %s6089_s30 }
 0xb24   :  { %v4289_v0 = vpop.permute.xlu0 %4288 }
 0xb25   :  { %4291 = vst.msk [vmem:[#allocation2 + $0x8] sm:$0xff] %vm3367_vm4, %v4289_v0  ;;  %v5021_v0 = vand.u32 4294901760, %v5020_v59 }
 0xb2c   :  { %v4293_v1 = vld [vmem:[#allocation2 + $0x8] sm:$0xff] }
 0xb2d   :  { %v4309_v2 = vsel %vm72_vm0, %v4293_v1, 0 }
 0xb2e   :  { %v4390_v3 = vand.u32 4294901760, %v4309_v2 }
 0xb30   :  { %v4391_v4 = vsub.f32 %v4309_v2, %v4390_v3  ;;  %6698 = vmatmul.mubr.f32.vlgmr.msra.gmra.mxu1 %v4390_v3  ;;  %v4886_v2 = vld [vmem:[%s7799_s7] sm:$0xff] }
 0xb31   :  { %6712 = vmatpush3.msra.mxu1 %v7367_v24  ;;  %6719 = vmatprep.mubr.f32.mxu1 %v4382_v19 }
 0xb32   :  { %6713 = vmatprep.subr.mxu1 %v7375_v28  ;;  %v4392_v5 = vand.u32 4294901760, %v4391_v4 }
 0xb33   :  { %6714 = vmatpush3.msra.mxu1 %v7375_v28 }
 0xb34   :  { %6715 = vmatprep.subr.mxu1 %v7388_v32  ;;  %v4393_v61 = vsub.f32 %v4391_v4, %v4392_v5 }
 0xb35   :  { %6716 = vmatpush3.msra.mxu1 %v7388_v32 }
 0xb36   :  { %6717 = vmatprep.subr.mxu1 %v7403_v38  ;;  %v4394_v6 = vand.u32 4294901760, %v4393_v61 }
 0xb37   :  { %6718 = vmatpush3.msra.mxu1 %v7403_v38 }
 0xb38   :  { %6720 = vmatmul.mubr.f32.vlgmr.msra.gmra.mxu1 %v4392_v5  ;;  %6733 = vmatprep.subr.mxu1 %v7367_v24 }
 0xb39   :  { %6687 = vmatmul.mubr.f32.vlgmr.msra.gmra.mxu0 %v4394_v6  ;;  %6734 = vmatpush3.msra.mxu1 %v7367_v24 }
 0xb3a   :  { %6701 = vmatpush3.msra.mxu0 %v7373_v27  ;;  %6741 = vmatprep.mubr.f32.mxu1 %v7344_v13 }
 0xb3b   :  { %6702 = vmatprep.subr.mxu0 %v7386_v31  ;;  %6708 = vmatprep.mubr.f32.mxu0 %v7350_v16 }
 0xb3c   :  { %6735 = vmatprep.subr.mxu1 %v7375_v28  ;;  %6703 = vmatpush3.msra.mxu0 %v7386_v31  ;;  %v6960_v31 = vld [vmem:[#allocation3 + $0x8] sm:$0xff] }
 0xb3d   :  { %6736 = vmatpush3.msra.mxu1 %v7375_v28  ;;  %6704 = vmatprep.subr.mxu0 %v7401_v37 }
 0xb3e   :  { %6737 = vmatprep.subr.mxu1 %v7388_v32  ;;  %6705 = vmatpush3.msra.mxu0 %v7401_v37 }
 0xb3f   :  { %6738 = vmatpush3.msra.mxu1 %v7388_v32  ;;  %6706 = vmatprep.subr.mxu0 %v4447_v46 }
 0xb40   :  { %6739 = vmatprep.subr.mxu1 %v7403_v38  ;;  %6707 = vmatpush3.msra.mxu0 %v4447_v46 }
 0xb41   :  { %6740 = vmatpush3.msra.mxu1 %v7403_v38  ;;  %6709 = vmatmul.mubr.f32.vlgmr.msra.gmra.mxu0 %v4391_v4  ;;  %v5035_v4 = vand.u32 4294901760, %v5034_v62  ;;  %v5434_v62 = vld [vmem:[%s7801_s9 + $0x8] sm:$0xff] }
 0xb42   :  { %6722 = vmatprep.subr.mxu0 %v7383_v30  ;;  %6742 = vmatmul.mubr.f32.vlgmr.msra.gmra.mxu1 %v4390_v3 }
 0xb43   :  { %6723 = vmatpush3.msra.mxu0 %v7383_v30  ;;  %6730 = vmatprep.mubr.f32.mxu0 %v7344_v13 }
 0xb44   :  { %6724 = vmatprep.subr.mxu0 %v7398_v36  ;;  %6755 = vmatprep.subr.mxu1 %v5021_v0 }
 0xb45   :  { %6725 = vmatpush3.msra.mxu0 %v7398_v36  ;;  %6756 = vmatpush3.msra.mxu1 %v5021_v0 }
 0xb46   :  { %6726 = vmatprep.subr.mxu0 %v7410_v43 }
 0xb47   :  { %6727 = vmatpush3.msra.mxu0 %v7410_v43 }
 0xb48   :  { %6728 = vmatprep.subr.mxu0 %v7418_v51 }
 0xb49   :  { %6729 = vmatpush3.msra.mxu0 %v7418_v51  ;;  %v7480_v51 = vand.u32 4294901760, %v4888_v48 }
 0xb4a   :  { %6731 = vmatmul.mubr.f32.vlgmr.msra.gmra.mxu0 %v4390_v3  ;;  %6744 = vmatprep.subr.mxu0 %v7478_v50  ;;  %v7517_v3 = vand.u32 4294901760, %v4886_v2 }
 0xb4b   :  { %v7488_v54 = vsub.f32 %v4888_v48, %v7480_v51  ;;  %6745 = vmatpush3.msra.mxu0 %v7478_v50 }
 0xb4c   :  { %6746 = vmatprep.subr.mxu0 %v7480_v51  ;;  %v7520_v5 = vsub.f32 %v4886_v2, %v7517_v3 }
 0xb4d   :  { %v7499_v58 = vand.u32 4294901760, %v7488_v54  ;;  %6747 = vmatpush3.msra.mxu0 %v7480_v51 }
 0xb4e   :  { %6748 = vmatprep.subr.mxu0 %v7482_v52  ;;  %v7525_v61 = vand.u32 4294901760, %v7520_v5 }
 0xb4f   :  { %v5027_v60 = vsub.f32 %v7488_v54, %v7499_v58  ;;  %6749 = vmatpush3.msra.mxu0 %v7482_v52 }
 0xb50   :  { %6750 = vmatprep.subr.mxu0 %v7517_v3  ;;  %v5041_v6 = vsub.f32 %v7520_v5, %v7525_v61 }
 0xb51   :  { %v5028_v1 = vand.u32 4294901760, %v5027_v60  ;;  %6751 = vmatpush3.msra.mxu0 %v7517_v3 }
 0xb52   :  { %6766 = vmatprep.subr.mxu0 %v7485_v53 }
 0xb53   :  { %6757 = vmatprep.subr.mxu1 %v5028_v1 }
 0xb54   :  { %6758 = vmatpush3.msra.mxu1 %v5028_v1 }
 0xb55   :  { %6759 = vmatprep.subr.mxu1 %v5035_v4 }
 0xb56   :  { %6760 = vmatpush3.msra.mxu1 %v5035_v4 }
 0xbf0   :  { %v6699_v9 = vpop.f32.mrf.mxu1 }
 0xbf2   :  { %v4487_v14 = vpop.f32.mrf.mxu1 }
 0xbf8   :  { %v6721_v16 = vpop.f32.mrf.mxu1 }
 0xbf9   :  { %v6688_v7 = vpop.f32.mrf.mxu0 }
 0xbfa   :  { %v4397_v11 = vadd.f32 %v6688_v7, %v6101_v8  ;;  %v4657_v21 = vpop.f32.mrf.mxu1  ;;  %v5042_v7 = vand.u32 4294901760, %v5041_v6 }
 0xbfb   :  { %v4386_v10 = vpop.f32.mrf.mxu0 }
 0xbfc   :  { %v4387_v12 = vadd.f32 %v6101_v8, %v4386_v10  ;;  %v4494_v15 = vadd.f32 %v6699_v9, %v4397_v11  ;;  %6761 = vmatprep.subr.mxu1 %v5042_v7 }
 0xbfd   :  { %6762 = vmatpush3.msra.mxu1 %v5042_v7 }
 0xbfe   :  { %v4488_v19 = vadd.f32 %v4487_v14, %v4387_v12  ;;  %6777 = vmatprep.subr.mxu1 %v7478_v50 }
 0xc01   :  { %v6710_v13 = vpop.f32.mrf.mxu0 }
 0xc02   :  { %v4581_v18 = vadd.f32 %v6710_v13, %v4494_v15  ;;  %v6743_v23 = vpop.f32.mrf.mxu1  ;;  %v6102_v15 = vld [vmem:[%s7797_s5] ss:$0 sm:$0xff]  ;;  %s6982_s5 = scalar_lea.vmem %s6089_s30, 256 }
 0xc03   :  { %v4573_v17 = vpop.f32.mrf.mxu0  ;;  %p6983_p5 = scmp.ne.s32.totalorder %s6089_s30, %s6982_s5  ;;  %p6988_p7 = scmp.lt.s32.totalorder %s6982_s5, %s6982_s5 }
 0xc04   :  { %v4574_v20 = vadd.f32 %v4573_v17, %v4488_v19  ;;  %v4666_v22 = vadd.f32 %v6721_v16, %v4581_v18  ;;  %v4829_v29 = vpop.f32.mrf.mxu1  ;;  %v6103_v17 = vld [vmem:[%s7798_s6] ss:$0 sm:$0xff] }
 0xc05   :  { %p6989_p8 = por %p6988_p7, %p6987_p6 }
 0xc06   :  { %v4658_v26 = vadd.f32 %v4657_v21, %v4574_v20 }
 0xc07   :  { %p6990_p9 = pnand %p6989_p8, %p6983_p5 }
 0xc0a   :  { %v6732_v24 = vpop.f32.mrf.mxu0 }
 0xc0b   :  { %v4755_v25 = vadd.f32 %v6732_v24, %v4666_v22 }
 0xc0c   :  { %v4748_v27 = vpop.f32.mrf.mxu0 }
 0xc0d   :  { %v4836_v28 = vadd.f32 %v6743_v23, %v4755_v25  ;;  %v4749_v55 = vadd.f32 %v4748_v27, %v4658_v26 }
 0xc0f   :  { %v4830_v30 = vadd.f32 %v4829_v29, %v4749_v55  ;;  %v4840_v32 = vadd.f32 %v6960_v31, %v4836_v28 }
 0xc11   :  { %v4846_v33 = vsel %vm72_vm0, %v4840_v32, 0.0  ;;  %v4839_v35 = vadd.f32 %v6961_v34, %v4830_v30 }
 0xc12   :  { %4847 = vadd.xlane.f32.xlu1 %v4846_v33 }
 0xc13   :  { %v4843_v36 = vsel %vm72_vm0, %v4839_v35, 0.0 }
 0xc14   :  { %4844 = vadd.xlane.f32.xlu0 %v4843_v36 }
 0xc9b   :  { %v4848_v37 = vpop.xlane.xlu1 %4847 }
 0xc9c   :  { %v4851_v38 = vmul.f32 0.03125, %v4848_v37  ;;  %v5439_v37 = vld [vmem:[%s7801_s9 + $0x30] sm:$0xff] }
 0xc9d   :  { %v4845_v39 = vpop.xlane.xlu0 %4844 }
 0xc9e   :  { %v4850_v40 = vmul.f32 0.03125, %v4845_v39  ;;  %v7463_v41 = vsub.f32 %v4840_v32, %v4851_v38  ;;  %v7587_v39 = vand.u32 4294901760, %v5439_v37 }
 0xca0   :  { %v4852_v42 = vsub.f32 %v4839_v35, %v4850_v40  ;;  %v4855_v45 = vmul.f32 %v7463_v41, %v7463_v41  ;;  %v5440_v35 = vld [vmem:[%s7801_s9 + $0x38] sm:$0xff]  ;;  %v5438_v40 = vld [vmem:[%s7801_s9 + $0x28] sm:$0xff] }
 0xca1   :  { %v7579_v36 = vand.u32 4294901760, %v5440_v35 }
 0xca2   :  { %v4854_v43 = vmul.f32 %v4852_v42, %v4852_v42  ;;  %v4859_v46 = vsel %vm72_vm0, %v4855_v45, 0.0 }
 0xca3   :  { %v7585_v38 = vsub.f32 %v5440_v35, %v7579_v36 }
 0xca4   :  { %v4856_v44 = vsel %vm72_vm0, %v4854_v43, 0.0  ;;  %v7600_v43 = vand.u32 4294901760, %v5438_v40 }
 0xca5   :  { %4857 = vadd.xlane.f32.xlu0 %v4856_v44  ;;  %v5437_v44 = vld [vmem:[%s7801_s9 + $0x20] sm:$0xff] }
 0xca6   :  { %v7613_v47 = vsub.f32 %v5438_v40, %v7600_v43  ;;  %v7615_v48 = vand.u32 4294901760, %v5437_v44 }
 0xca9   :  { %4860 = vadd.xlane.f32.xlu0 %v4859_v46 }
 0xd2e   :  { %v4858_v8 = vpop.xlane.xlu0 %4857 }
 0xd2f   :  { %v4862_v9 = vmul.f32 0.03125, %v4858_v8 }
 0xd31   :  { %v4864_v10 = vadd.f32 1e-05, %v4862_v9 }
 0xd32   :  { %v4861_v11 = vpop.xlane.xlu0 %4860 }
 0xd33   :  { %6952 = vrsqrt.f32 %v4864_v10  ;;  %v4863_v12 = vmul.f32 0.03125, %v4861_v11 }
 0xd35   :  { %v4865_v13 = vadd.f32 1e-05, %v4863_v12 }
 0xd37   :  { %6954 = vrsqrt.f32 %v4865_v13 }
 0xd40   :  { %v6953_v14 = vpop.eup %6952 }
 0xd41   :  { %v4868_v16 = vmul.f32 %v6953_v14, %v4852_v42  ;;  %v7598_v42 = vsub.f32 %v5439_v37, %v7587_v39 }
 0xd43   :  { %v4876_v18 = vmul.f32 %v6102_v15, %v4868_v16  ;;  %v7610_v46 = vand.u32 4294901760, %v7598_v42 }
 0xd44   :  { %v6955_v19 = vpop.eup %6954 }
 0xd45   :  { %v7537_v20 = vadd.f32 %v6103_v17, %v4876_v18  ;;  %v4869_v21 = vmul.f32 %v6955_v19, %v7463_v41  ;;  %v7595_v41 = vand.u32 4294901760, %v7585_v38 }
 0xd47   :  { %v4898_v22 = vsel %vm72_vm0, %v7537_v20, 0  ;;  %v4877_v23 = vmul.f32 %v6102_v15, %v4869_v21  ;;  %v5568_v45 = vsub.f32 %v7585_v38, %v7595_v41 }
 0xd48   :  { %v4972_v24 = vand.u32 4294901760, %v4898_v22 }
 0xd49   :  { %v7542_v25 = vadd.f32 %v6103_v17, %v4877_v23 }
 0xd4a   :  { %6763 = vmatprep.mubr.f32.mxu1 %v4972_v24  ;;  %v4973_v26 = vsub.f32 %v4898_v22, %v4972_v24  ;;  %v6104_v22 = vld [vmem:[%s7800_s8] ss:$0 sm:$0xff] }
 0xd4b   :  { %v4901_v27 = vsel %vm72_vm0, %v7542_v25, 0 }
 0xd4c   :  { %v4982_v28 = vand.u32 4294901760, %v4901_v27  ;;  %v4974_v55 = vand.u32 4294901760, %v4973_v26 }
 0xd4e   :  { %v4983_v29 = vsub.f32 %v4901_v27, %v4982_v28  ;;  %6764 = vmatmul.mubr.f32.vlgmr.msra.gmra.mxu1 %v4982_v28  ;;  %v4975_v30 = vsub.f32 %v4973_v26, %v4974_v55 }
 0xd4f   :  { %6778 = vmatpush3.msra.mxu1 %v7478_v50  ;;  %6785 = vmatprep.mubr.f32.mxu1 %v4974_v55 }
 0xd50   :  { %6779 = vmatprep.subr.mxu1 %v7480_v51  ;;  %v4976_v31 = vand.u32 4294901760, %v4975_v30  ;;  %v4984_v32 = vand.u32 4294901760, %v4983_v29 }
 0xd51   :  { %6780 = vmatpush3.msra.mxu1 %v7480_v51 }
 0xd52   :  { %6781 = vmatprep.subr.mxu1 %v7482_v52  ;;  %6752 = vmatprep.mubr.f32.mxu0 %v4976_v31  ;;  %v4985_v33 = vsub.f32 %v4983_v29, %v4984_v32 }
 0xd53   :  { %6782 = vmatpush3.msra.mxu1 %v7482_v52 }
 0xd54   :  { %6783 = vmatprep.subr.mxu1 %v7517_v3  ;;  %v4986_v34 = vand.u32 4294901760, %v4985_v33 }
 0xd55   :  { %6784 = vmatpush3.msra.mxu1 %v7517_v3 }
 0xd56   :  { %6786 = vmatmul.mubr.f32.vlgmr.msra.gmra.mxu1 %v4984_v32  ;;  %6799 = vmatprep.subr.mxu1 %v7478_v50 }
 0xd57   :  { %6753 = vmatmul.mubr.f32.vlgmr.msra.gmra.mxu0 %v4986_v34  ;;  %6800 = vmatpush3.msra.mxu1 %v7478_v50  ;;  %v5569_v50 = vand.u32 4294901760, %v5568_v45 }
 0xd58   :  { %6767 = vmatpush3.msra.mxu0 %v7485_v53  ;;  %6807 = vmatprep.mubr.f32.mxu1 %v4972_v24  ;;  %v7628_v53 = vsub.f32 %v5437_v44, %v7615_v48 }
 0xd59   :  { %6768 = vmatprep.subr.mxu0 %v7488_v54  ;;  %6774 = vmatprep.mubr.f32.mxu0 %v4973_v26 }
 0xd5a   :  { %6801 = vmatprep.subr.mxu1 %v7480_v51  ;;  %6769 = vmatpush3.msra.mxu0 %v7488_v54  ;;  %v7631_v54 = vand.u32 4294901760, %v5436_v49 }
 0xd5b   :  { %6802 = vmatpush3.msra.mxu1 %v7480_v51  ;;  %6770 = vmatprep.subr.mxu0 %v7491_v56  ;;  %v5575_v51 = vsub.f32 %v7598_v42, %v7610_v46 }
 0xd5c   :  { %6803 = vmatprep.subr.mxu1 %v7482_v52  ;;  %6771 = vmatpush3.msra.mxu0 %v7491_v56  ;;  %v5435_v56 = vld [vmem:[%s7801_s9 + $0x10] sm:$0xff]  ;;  %v7645_v60 = vsub.f32 %v5436_v49, %v7631_v54 }
 0xd5d   :  { %6804 = vmatpush3.msra.mxu1 %v7482_v52  ;;  %6772 = vmatprep.subr.mxu0 %v7520_v5  ;;  %v7625_v52 = vand.u32 4294901760, %v7613_v47  ;;  %v7642_v59 = vand.u32 4294901760, %v5435_v56 }
 0xd5e   :  { %6805 = vmatprep.subr.mxu1 %v7517_v3  ;;  %6773 = vmatpush3.msra.mxu0 %v7520_v5  ;;  %v7660_v4 = vand.u32 4294901760, %v7645_v60  ;;  %v5433_v5 = vld [vmem:[%s7801_s9] sm:$0xff] }
 0xd5f   :  { %6806 = vmatpush3.msra.mxu1 %v7517_v3  ;;  %6775 = vmatmul.mubr.f32.vlgmr.msra.gmra.mxu0 %v4983_v29  ;;  %v7654_v2 = vsub.f32 %v5435_v56, %v7642_v59  ;;  %v7656_v3 = vand.u32 4294901760, %v5434_v62  ;;  %v7672_v8 = vand.u32 4294901760, %v5433_v5 }
 0xd60   :  { %6788 = vmatprep.subr.mxu0 %v7496_v57  ;;  %6808 = vmatmul.mubr.f32.vlgmr.msra.gmra.mxu1 %v4982_v28  ;;  %v5596_v9 = vsub.f32 %v7645_v60, %v7660_v4 }
 0xd61   :  { %6789 = vmatpush3.msra.mxu0 %v7496_v57  ;;  %6796 = vmatprep.mubr.f32.mxu0 %v4972_v24  ;;  %v5576_v57 = vand.u32 4294901760, %v5575_v51  ;;  %v7667_v6 = vand.u32 4294901760, %v7654_v2  ;;  %v7670_v7 = vsub.f32 %v5434_v62, %v7656_v3  ;;  %v7684_v12 = vsub.f32 %v5433_v5, %v7672_v8 }
 0xd62   :  { %6790 = vmatprep.subr.mxu0 %v7499_v58  ;;  %6829 = vmatprep.subr.mxu1 %v5569_v50  ;;  %v5597_v13 = vand.u32 4294901760, %v5596_v9 }
 0xd63   :  { %6791 = vmatpush3.msra.mxu0 %v7499_v58  ;;  %v5582_v58 = vsub.f32 %v7613_v47, %v7625_v52  ;;  %6830 = vmatpush3.msra.mxu1 %v5569_v50  ;;  %v5603_v10 = vsub.f32 %v7654_v2, %v7667_v6  ;;  %v7681_v11 = vand.u32 4294901760, %v7670_v7  ;;  %v7691_v16 = vand.u32 4294901760, %v7684_v12 }
 0xd64   :  { %6792 = vmatprep.subr.mxu0 %v7502_v63  ;;  %6831 = vmatprep.subr.mxu1 %v5576_v57 }
 0xd65   :  { %6793 = vmatpush3.msra.mxu0 %v7502_v63  ;;  %v7640_v63 = vand.u32 4294901760, %v7628_v53  ;;  %v5583_v0 = vand.u32 4294901760, %v5582_v58  ;;  %6832 = vmatpush3.msra.mxu1 %v5576_v57  ;;  %v5604_v14 = vand.u32 4294901760, %v5603_v10  ;;  %v5610_v15 = vsub.f32 %v7670_v7, %v7681_v11 }
 0xd66   :  { %6794 = vmatprep.subr.mxu0 %v7525_v61  ;;  %v5617_v18 = vsub.f32 %v7684_v12, %v7691_v16 }
 0xd67   :  { %6795 = vmatpush3.msra.mxu0 %v7525_v61  ;;  %v5589_v1 = vsub.f32 %v7628_v53, %v7640_v63  ;;  %6833 = vmatprep.subr.mxu1 %v5583_v0  ;;  %v5611_v17 = vand.u32 4294901760, %v5610_v15 }
 0xd68   :  { %6797 = vmatmul.mubr.f32.vlgmr.msra.gmra.mxu0 %v4982_v28  ;;  %6810 = vmatprep.subr.mxu0 %v7579_v36  ;;  %v5618_v19 = vand.u32 4294901760, %v5617_v18 }
 0xd69   :  { %6811 = vmatpush3.msra.mxu0 %v7579_v36  ;;  %v5590_v61 = vand.u32 4294901760, %v5589_v1  ;;  %6834 = vmatpush3.msra.mxu1 %v5583_v0 }
 0xd6a   :  { %6812 = vmatprep.subr.mxu0 %v7587_v39 }
 0xd6b   :  { %6813 = vmatpush3.msra.mxu0 %v7587_v39  ;;  %6835 = vmatprep.subr.mxu1 %v5590_v61 }
 0xd6c   :  { %6814 = vmatprep.subr.mxu0 %v7600_v43  ;;  %6836 = vmatpush3.msra.mxu1 %v5590_v61 }
 0xd6d   :  { %6815 = vmatpush3.msra.mxu0 %v7600_v43  ;;  %6837 = vmatprep.subr.mxu1 %v5597_v13 }
 0xd6e   :  { %6816 = vmatprep.subr.mxu0 %v7615_v48  ;;  %6838 = vmatpush3.msra.mxu1 %v5597_v13 }
 0xd6f   :  { %6817 = vmatpush3.msra.mxu0 %v7615_v48  ;;  %6839 = vmatprep.subr.mxu1 %v5604_v14 }
 0xd70   :  { %6818 = vmatprep.subr.mxu0 %v7631_v54  ;;  %6840 = vmatpush3.msra.mxu1 %v5604_v14 }
 0xd71   :  { %6819 = vmatpush3.msra.mxu0 %v7631_v54  ;;  %6841 = vmatprep.subr.mxu1 %v5611_v17 }
 0xd72   :  { %6820 = vmatprep.subr.mxu0 %v7642_v59  ;;  %6842 = vmatpush3.msra.mxu1 %v5611_v17 }
 0xd73   :  { %6821 = vmatpush3.msra.mxu0 %v7642_v59  ;;  %6843 = vmatprep.subr.mxu1 %v5618_v19 }
 0xd74   :  { %6822 = vmatprep.subr.mxu0 %v7656_v3  ;;  %6844 = vmatpush3.msra.mxu1 %v5618_v19 }
 0xd75   :  { %6823 = vmatpush3.msra.mxu0 %v7656_v3  ;;  %6867 = vmatprep.subr.mxu1 %v7579_v36 }
 0xd76   :  { %6824 = vmatprep.subr.mxu0 %v7672_v8 }
 0xd77   :  { %6825 = vmatpush3.msra.mxu0 %v7672_v8 }
 0xd78   :  { %6848 = vmatprep.subr.mxu0 %v7585_v38 }
 0xe0e   :  { %v6765_v23 = vpop.f32.mrf.mxu1 }
 0xe10   :  { %v5079_v55 = vpop.f32.mrf.mxu1 }
 0xe16   :  { %v6787_v30 = vpop.f32.mrf.mxu1 }
 0xe17   :  { %v6754_v21 = vpop.f32.mrf.mxu0 }
 0xe18   :  { %v4989_v26 = vadd.f32 %v6754_v21, %v6104_v22  ;;  %v5249_v35 = vpop.f32.mrf.mxu1 }
 0xe19   :  { %v4978_v24 = vpop.f32.mrf.mxu0 }
 0xe1a   :  { %v4979_v27 = vadd.f32 %v6104_v22, %v4978_v24  ;;  %v5086_v29 = vadd.f32 %v6765_v23, %v4989_v26 }
 0xe1c   :  { %v5080_v33 = vadd.f32 %v5079_v55, %v4979_v27 }
 0xe1f   :  { %v6776_v28 = vpop.f32.mrf.mxu0 }
 0xe20   :  { %v5173_v32 = vadd.f32 %v6776_v28, %v5086_v29  ;;  %v6809_v40 = vpop.f32.mrf.mxu1 }
 0xe21   :  { %v5165_v31 = vpop.f32.mrf.mxu0 }
 0xe22   :  { %v5166_v34 = vadd.f32 %v5165_v31, %v5080_v33  ;;  %v5258_v37 = vadd.f32 %v6787_v30, %v5173_v32  ;;  %v5421_v57 = vpop.f32.mrf.mxu1 }
 0xe24   :  { %v5250_v49 = vadd.f32 %v5249_v35, %v5166_v34 }
 0xe28   :  { %v6798_v44 = vpop.f32.mrf.mxu0 }
 0xe29   :  { %v5347_v45 = vadd.f32 %v6798_v44, %v5258_v37 }
 0xe2a   :  { %v5340_v50 = vpop.f32.mrf.mxu0 }
 0xe2b   :  { %v5428_v51 = vadd.f32 %v6809_v40, %v5347_v45  ;;  %v5341_v56 = vadd.f32 %v5340_v50, %v5250_v49 }
 0xe2d   :  { %v5432_v58 = vmax.f32 %v5428_v51, 0.0  ;;  %v5422_v62 = vadd.f32 %v5421_v57, %v5341_v56  ;;  %v6106_v51 = vld [vmem:[%s7803_s11] ss:$0 sm:$0xff] }
 0xe2f   :  { %v5453_v0 = vsel %vm5448_vm5, %v5432_v58, 0  ;;  %v5431_v1 = vmax.f32 %v5422_v62, 0.0  ;;  %v6107_v58 = vld [vmem:[%s7804_s12] ss:$0 sm:$0xff] }
 0xe30   :  { %v7701_v5 = vand.u32 4294901760, %v5453_v0 }
 0xe31   :  { %v5450_v61 = vsel %vm5448_vm5, %v5431_v1, 0 }
 0xe32   :  { %v5539_v9 = vsub.f32 %v5453_v0, %v7701_v5  ;;  %v5528_v10 = vand.u32 4294901760, %v5450_v61 }
 0xe34   :  { %v5529_v13 = vsub.f32 %v5450_v61, %v5528_v10  ;;  %6845 = vmatprep.mubr.f32.mxu1 %v5528_v10  ;;  %v5540_v14 = vand.u32 4294901760, %v5539_v9 }
 0xe35   :  { %6846 = vmatmul.mubr.f32.vlgmr.msra.gmra.mxu1 %v7701_v5 }
 0xe36   :  { %6868 = vmatpush3.msra.mxu1 %v7579_v36  ;;  %v5530_v15 = vand.u32 4294901760, %v5529_v13  ;;  %v5541_v17 = vsub.f32 %v5539_v9, %v5540_v14 }
 0xe37   :  { %6869 = vmatprep.subr.mxu1 %v7587_v39 }
 0xe38   :  { %6870 = vmatpush3.msra.mxu1 %v7587_v39  ;;  %6883 = vmatprep.mubr.f32.mxu1 %v5530_v15  ;;  %v5531_v18 = vsub.f32 %v5529_v13, %v5530_v15  ;;  %v5542_v21 = vand.u32 4294901760, %v5541_v17 }
 0xe39   :  { %6871 = vmatprep.subr.mxu1 %v7600_v43 }
 0xe3a   :  { %6872 = vmatpush3.msra.mxu1 %v7600_v43  ;;  %v5532_v19 = vand.u32 4294901760, %v5531_v18 }
 0xe3b   :  { %6873 = vmatprep.subr.mxu1 %v7615_v48 }
 0xe3c   :  { %6874 = vmatpush3.msra.mxu1 %v7615_v48  ;;  %6826 = vmatprep.mubr.f32.mxu0 %v5532_v19 }
 0xe3d   :  { %6875 = vmatprep.subr.mxu1 %v7631_v54  ;;  %6827 = vmatmul.mubr.f32.vlgmr.msra.gmra.mxu0 %v5542_v21 }
 0xe3e   :  { %6849 = vmatpush3.msra.mxu0 %v7585_v38  ;;  %6876 = vmatpush3.msra.mxu1 %v7631_v54  ;;  %v6105_v38 = vld [vmem:[%s7802_s10] ss:$0 sm:$0xff] }
 0xe3f   :  { %6850 = vmatprep.subr.mxu0 %v7598_v42  ;;  %6864 = vmatprep.mubr.f32.mxu0 %v5529_v13 }
 0xe40   :  { %6877 = vmatprep.subr.mxu1 %v7642_v59  ;;  %6851 = vmatpush3.msra.mxu0 %v7598_v42 }
 0xe41   :  { %6878 = vmatpush3.msra.mxu1 %v7642_v59  ;;  %6852 = vmatprep.subr.mxu0 %v7613_v47 }
 0xe42   :  { %6879 = vmatprep.subr.mxu1 %v7656_v3  ;;  %6853 = vmatpush3.msra.mxu0 %v7613_v47 }
 0xe43   :  { %6880 = vmatpush3.msra.mxu1 %v7656_v3  ;;  %6854 = vmatprep.subr.mxu0 %v7628_v53 }
 0xe44   :  { %6881 = vmatprep.subr.mxu1 %v7672_v8  ;;  %6855 = vmatpush3.msra.mxu0 %v7628_v53 }
 0xe45   :  { %6882 = vmatpush3.msra.mxu1 %v7672_v8  ;;  %6856 = vmatprep.subr.mxu0 %v7645_v60 }
 0xe46   :  { %6884 = vmatmul.mubr.f32.vlgmr.msra.gmra.mxu1 %v5540_v14  ;;  %6905 = vmatprep.subr.mxu1 %v7579_v36 }
 0xe47   :  { %6857 = vmatpush3.msra.mxu0 %v7645_v60  ;;  %6906 = vmatpush3.msra.mxu1 %v7579_v36 }
 0xe48   :  { %6921 = vmatprep.mubr.f32.mxu1 %v5528_v10  ;;  %6858 = vmatprep.subr.mxu0 %v7654_v2 }
 0xe49   :  { %6907 = vmatprep.subr.mxu1 %v7587_v39  ;;  %6859 = vmatpush3.msra.mxu0 %v7654_v2 }
 0xe4a   :  { %6908 = vmatpush3.msra.mxu1 %v7587_v39  ;;  %6860 = vmatprep.subr.mxu0 %v7670_v7 }
 0xe4b   :  { %6909 = vmatprep.subr.mxu1 %v7600_v43  ;;  %6861 = vmatpush3.msra.mxu0 %v7670_v7 }
 0xe4c   :  { %6910 = vmatpush3.msra.mxu1 %v7600_v43  ;;  %6862 = vmatprep.subr.mxu0 %v7684_v12 }
 0xe4d   :  { %6911 = vmatprep.subr.mxu1 %v7615_v48  ;;  %6863 = vmatpush3.msra.mxu0 %v7684_v12 }
 0xe4e   :  { %6912 = vmatpush3.msra.mxu1 %v7615_v48  ;;  %6865 = vmatmul.mubr.f32.vlgmr.msra.gmra.mxu0 %v5539_v9 }
 0xe4f   :  { %6886 = vmatprep.subr.mxu0 %v7595_v41  ;;  %6913 = vmatprep.subr.mxu1 %v7631_v54 }
 0xe50   :  { %6887 = vmatpush3.msra.mxu0 %v7595_v41  ;;  %6902 = vmatprep.mubr.f32.mxu0 %v5528_v10 }
 0xe51   :  { %6914 = vmatpush3.msra.mxu1 %v7631_v54  ;;  %6888 = vmatprep.subr.mxu0 %v7610_v46 }
 0xe52   :  { %6915 = vmatprep.subr.mxu1 %v7642_v59  ;;  %6889 = vmatpush3.msra.mxu0 %v7610_v46 }
 0xe53   :  { %6916 = vmatpush3.msra.mxu1 %v7642_v59  ;;  %6890 = vmatprep.subr.mxu0 %v7625_v52 }
 0xe54   :  { %6917 = vmatprep.subr.mxu1 %v7656_v3  ;;  %6891 = vmatpush3.msra.mxu0 %v7625_v52 }
 0xe55   :  { %6918 = vmatpush3.msra.mxu1 %v7656_v3  ;;  %6892 = vmatprep.subr.mxu0 %v7640_v63 }
 0xe56   :  { %6919 = vmatprep.subr.mxu1 %v7672_v8  ;;  %6893 = vmatpush3.msra.mxu0 %v7640_v63 }
 0xe57   :  { %6920 = vmatpush3.msra.mxu1 %v7672_v8  ;;  %6894 = vmatprep.subr.mxu0 %v7660_v4 }
 0xe58   :  { %6922 = vmatmul.mubr.f32.vlgmr.msra.gmra.mxu1 %v7701_v5  ;;  %6895 = vmatpush3.msra.mxu0 %v7660_v4 }
 0xe59   :  { %6896 = vmatprep.subr.mxu0 %v7667_v6 }
 0xe5a   :  { %6897 = vmatpush3.msra.mxu0 %v7667_v6 }
 0xe5b   :  { %6898 = vmatprep.subr.mxu0 %v7681_v11 }
 0xe5c   :  { %6899 = vmatpush3.msra.mxu0 %v7681_v11 }
 0xe5d   :  { %6900 = vmatprep.subr.mxu0 %v7691_v16 }
 0xe5e   :  { %6901 = vmatpush3.msra.mxu0 %v7691_v16 }
 0xe5f   :  { %6903 = vmatmul.mubr.f32.vlgmr.msra.gmra.mxu0 %v7701_v5 }
 0xef5   :  { %v6847_v39 = vpop.f32.mrf.mxu1 }
 0xef7   :  { %v5655_v47 = vpop.f32.mrf.mxu1 }
 0xefd   :  { %v6828_v36 = vpop.f32.mrf.mxu0 }
 0xefe   :  { %v5545_v42 = vadd.f32 %v6828_v36, %v6105_v38 }
 0xeff   :  { %v5534_v41 = vpop.f32.mrf.mxu0 }
 0xf00   :  { %v5535_v46 = vadd.f32 %v6105_v38, %v5534_v41  ;;  %v5662_v48 = vadd.f32 %v6847_v39, %v5545_v42 }
 0xf02   :  { %v5656_v63 = vadd.f32 %v5655_v47, %v5535_v46 }
 0xf06   :  { %v6885_v52 = vpop.f32.mrf.mxu1 }
 0xf08   :  { %v5837_v60 = vpop.f32.mrf.mxu1 }
 0xf0e   :  { %v6866_v43 = vpop.f32.mrf.mxu0 }
 0xf0f   :  { %v5757_v54 = vadd.f32 %v6866_v43, %v5662_v48 }
 0xf10   :  { %v5749_v53 = vpop.f32.mrf.mxu0 }
 0xf11   :  { %v5750_v59 = vadd.f32 %v5749_v53, %v5656_v63  ;;  %v5846_v2 = vadd.f32 %v6885_v52, %v5757_v54 }
 0xf13   :  { %v5838_v7 = vadd.f32 %v5837_v60, %v5750_v59 }
 0xf18   :  { %v6923_v3 = vpop.f32.mrf.mxu1 }
 0xf1a   :  { %v6025_v16 = vpop.f32.mrf.mxu1 }
 0xf1f   :  { %v6904_v4 = vpop.f32.mrf.mxu0 }
 0xf20   :  { %v5947_v6 = vadd.f32 %v6904_v4, %v5846_v2 }
 0xf21   :  { %v5940_v8 = vpop.f32.mrf.mxu0 }
 0xf22   :  { %v6032_v11 = vadd.f32 %v6923_v3, %v5947_v6  ;;  %v5941_v12 = vadd.f32 %v5940_v8, %v5838_v7 }
 0xf24   :  { %v6026_v22 = vadd.f32 %v6025_v16, %v5941_v12  ;;  %v6036_v23 = vadd.f32 %v6032_v11, %v7542_v25 }
 0xf26   :  { %v6042_v24 = vsel %vm72_vm0, %v6036_v23, 0.0  ;;  %v6035_v26 = vadd.f32 %v6026_v22, %v7537_v20 }
 0xf27   :  { %6043 = vadd.xlane.f32.xlu1 %v6042_v24 }
 0xf28   :  { %v6039_v27 = vsel %vm72_vm0, %v6035_v26, 0.0 }
 0xf29   :  { %6040 = vadd.xlane.f32.xlu0 %v6039_v27 }
 0xfb0   :  { %v6044_v28 = vpop.xlane.xlu1 %6043 }
 0xfb1   :  { %v6046_v55 = vmul.f32 0.03125, %v6044_v28 }
 0xfb2   :  { %v6041_v29 = vpop.xlane.xlu0 %6040 }
 0xfb3   :  { %v6048_v30 = vsub.f32 %v6036_v23, %v6046_v55  ;;  %v6045_v31 = vmul.f32 0.03125, %v6041_v29 }
 0xfb5   :  { %v6047_v32 = vsub.f32 %v6035_v26, %v6045_v31  ;;  %v6050_v33 = vmul.f32 %v6048_v30, %v6048_v30 }
 0xfb7   :  { %v6054_v34 = vsel %vm72_vm0, %v6050_v33, 0.0  ;;  %v6049_v35 = vmul.f32 %v6047_v32, %v6047_v32 }
 0xfb8   :  { %6055 = vadd.xlane.f32.xlu1 %v6054_v34 }
 0xfb9   :  { %v6051_v25 = vsel %vm72_vm0, %v6049_v35, 0.0 }
 0xfba   :  { %6052 = vadd.xlane.f32.xlu0 %v6051_v25 }
0x1041   :  { %v6056_v37 = vpop.xlane.xlu1 %6055 }
0x1042   :  { %v6058_v20 = vmul.f32 0.03125, %v6056_v37 }
0x1043   :  { %v6053_v40 = vpop.xlane.xlu0 %6052 }
0x1044   :  { %v6060_v44 = vadd.f32 1e-05, %v6058_v20  ;;  %v6057_v45 = vmul.f32 0.03125, %v6053_v40 }
0x1046   :  { %6956 = vrsqrt.f32 %v6060_v44  ;;  %v6059_v49 = vadd.f32 1e-05, %v6057_v45 }
0x1048   :  { %6958 = vrsqrt.f32 %v6059_v49 }
0x1053   :  { %v6957_v50 = vpop.eup %6956 }
0x1054   :  { %v6064_v56 = vmul.f32 %v6957_v50, %v6048_v30 }
0x1055   :  { %v6959_v57 = vpop.eup %6958 }
0x1056   :  { %v6063_v62 = vmul.f32 %v6959_v57, %v6047_v32  ;;  %v6072_v0 = vmul.f32 %v6106_v51, %v6064_v56 }
0x1058   :  { %v6071_v1 = vmul.f32 %v6106_v51, %v6063_v62  ;;  %v6080_v5 = vadd.f32 %v6107_v58, %v6072_v0 }
0x105a   :  { %v6079_v61 = vadd.f32 %v6107_v58, %v6071_v1  ;;  %6082 = vst.msk [vmem:[#allocation6 + $0x8] sm:$0xff] %vm72_vm0, %v6080_v5 }
0x105c   :  { %6081 = vst.msk [vmem:[#allocation6] sm:$0xff] %vm72_vm0, %v6079_v61 }
0x105d   :  { %6993 = shalt.err (!%p6990_p9)
}
0x105e   :  { %6094 = dma.vmem_to_hbm [thread:$0]  %s6089_s30, 256, %s7805_s13, [#allocation5], %s7007_s28, %s7007_s28, %s7008_s29  }
0x105f   :  { %7004 = dma.done.wait [#allocation5], 256  }
0x1060   :  { %7005 = vsyncadd [#allocation5], 4294967040 }
0x1061   :  { %6098 = vsyncpa [#allocation4], 1 }
0x1062   :  { %6099 = vsyncpa [#allocation5], 1 }

</bundles_post_ra>
